<compile_context>
chip_gen: v7x
topology: tpu7x:2x2x1
jax: 0.10.0
libtpu: 0.0.40
codegen_flags: <defaults>
</compile_context>

<pallas_src>
import jax
import jax.numpy as jnp
from jax.experimental import pallas as pl
from jax.experimental.pallas import tpu as pltpu

_LANE = 128


def _round_up(n, m):
    return ((n + m - 1) // m) * m


def _lstm_encoder_kernel(x_ref, wih_ref, whh_ref, b_ref, out_ref, hlast_ref):
    # x_ref:     (B, T, I)    batch-first input
    # wih_ref:   (I, 4*Hp)    input->gates weights, each gate padded to Hp=128 lanes
    # whh_ref:   (Hp, 4*Hp)   hidden->gates weights (padded rows/lanes are zero)
    # b_ref:     (1, 4*Hp)    combined bias b_ih + b_hh (padded lanes zero)
    # out_ref:   (B, T, Hp)   hidden state at every timestep (padded lanes are 0)
    # hlast_ref: (B, Hp)      final hidden state (== out[:, -1] for num_layers=1)
    B, T, I = x_ref.shape
    Hp = whh_ref.shape[0]
    G = 4 * Hp

    # Small grid-invariant operands: load once, stay resident for the whole loop.
    wih = wih_ref[...]
    whh = whh_ref[...]
    b = b_ref[...]                      # (1, 4Hp) -> free sublane broadcast

    # ---- Hoisted input projection (+ bias), off the serial h-chain -------------
    x2d = x_ref[...].reshape(B * T, I)                                   # (B*T, I)
    pre = jnp.dot(x2d, wih, preferred_element_type=jnp.float32) + b      # (B*T, 4Hp)
    pre = pre.reshape(B, T, G)                                           # (B, T, 4Hp)

    h = jnp.zeros((B, Hp), jnp.float32)
    c = jnp.zeros((B, Hp), jnp.float32)

    # ---- Time recurrence: one matmul + elementwise per step ---------------------
    # T is static and small -> fully unrolled; all slices/stores are static.
    for t in range(T):
        gates = pre[:, t, :] + jnp.dot(h, whh, preferred_element_type=jnp.float32)
        # Gate slabs are 128-lane aligned -> extraction is a free vreg pick.
        i = jax.nn.sigmoid(gates[:, 0 * Hp:1 * Hp])
        f = jax.nn.sigmoid(gates[:, 1 * Hp:2 * Hp])
        g = jnp.tanh(gates[:, 2 * Hp:3 * Hp])
        o = jax.nn.sigmoid(gates[:, 3 * Hp:4 * Hp])
        c = f * c + i * g
        h = o * jnp.tanh(c)
        out_ref[:, t, :] = h.astype(out_ref.dtype)   # lane-dense (Hp=128) store

    hlast_ref[...] = h.astype(hlast_ref.dtype)


def init_lstm_params(key, input_size, hidden_size):
    """PyTorch nn.LSTM init: U(-1/sqrt(H), 1/sqrt(H)); weights kept (in, 4H), gate order i,f,g,o."""
    k1, k2, k3, k4 = jax.random.split(key, 4)
    bound = 1.0 / float(hidden_size) ** 0.5
    w_ih = jax.random.uniform(k1, (input_size, 4 * hidden_size), jnp.float32, -bound, bound)
    w_hh = jax.random.uniform(k2, (hidden_size, 4 * hidden_size), jnp.float32, -bound, bound)
    b_ih = jax.random.uniform(k3, (1, 4 * hidden_size), jnp.float32, -bound, bound)
    b_hh = jax.random.uniform(k4, (1, 4 * hidden_size), jnp.float32, -bound, bound)
    return {"w_ih": w_ih, "w_hh": w_hh, "b": b_ih + b_hh}


def pack_lstm_params(params, hidden_size):
    """One-time repack: pad every gate block to a full 128-lane slab (zeros elsewhere)."""
    w_ih, w_hh, b = params["w_ih"], params["w_hh"], params["b"]
    I = w_ih.shape[0]
    H = hidden_size
    Hp = _round_up(max(H, _LANE), _LANE)
    wih_p = jnp.zeros((I, 4 * Hp), jnp.float32)
    whh_p = jnp.zeros((Hp, 4 * Hp), jnp.float32)
    b_p = jnp.zeros((1, 4 * Hp), jnp.float32)
    for k in range(4):
        wih_p = wih_p.at[:, k * Hp:k * Hp + H].set(w_ih[:, k * H:(k + 1) * H])
        whh_p = whh_p.at[:H, k * Hp:k * Hp + H].set(w_hh[:, k * H:(k + 1) * H])
        b_p = b_p.at[:, k * Hp:k * Hp + H].set(b[:, k * H:(k + 1) * H])
    return {"w_ih": wih_p, "w_hh": whh_p, "b": b_p, "hidden_size": H}


def lstm_encoder_forward(x, packed):
    """x: (B, T, input_size) f32, batch_first. Returns (out, h_last) like BaseLSTMEncoder.forward."""
    wih_p, whh_p, b_p = packed["w_ih"], packed["w_hh"], packed["b"]
    H = packed["hidden_size"]
    B, T, I = x.shape
    Hp = whh_p.shape[0]

    def full_spec(shape):
        return pl.BlockSpec(shape, lambda: (0,) * len(shape))

    flops = 2 * B * T * 4 * Hp * (I + Hp)        # hoisted GEMM + per-step recurrent GEMM
    transcendentals = 5 * B * T * Hp             # 3 sigmoid + 2 tanh per hidden element
    bytes_accessed = 4 * (x.size + wih_p.size + whh_p.size + b_p.size + B * T * Hp + B * Hp)

    out_p, hlast_p = pl.pallas_call(
        _lstm_encoder_kernel,
        out_shape=(
            jax.ShapeDtypeStruct((B, T, Hp), jnp.float32),
            jax.ShapeDtypeStruct((B, Hp), jnp.float32),
        ),
        grid=(),
        in_specs=[
            full_spec(x.shape),
            full_spec(wih_p.shape),
            full_spec(whh_p.shape),
            full_spec(b_p.shape),
        ],
        out_specs=(
            full_spec((B, T, Hp)),
            full_spec((B, Hp)),
        ),
        cost_estimate=pl.CostEstimate(
            flops=flops,
            transcendentals=transcendentals,
            bytes_accessed=bytes_accessed,
        ),
        compiler_params=pltpu.CompilerParams(),
    )(x, wih_p, whh_p, b_p)

    # Only wrapper-side op: strip the lane padding back to H (padded lanes are exactly 0).
    return out_p[..., :H], hlast_p[..., :H]


def _ref_lstm(x, params):
    """Pure-JAX reference with identical semantics (PyTorch gate order i, f, g, o)."""
    w_ih, w_hh, b = params["w_ih"], params["w_hh"], params["b"]
    B, T, _ = x.shape
    H = w_hh.shape[0]
    h = jnp.zeros((B, H), jnp.float32)
    c = jnp.zeros((B, H), jnp.float32)
    outs = []
    for t in range(T):
        gates = x[:, t, :] @ w_ih + h @ w_hh + b
        i = jax.nn.sigmoid(gates[:, 0 * H:1 * H])
        f = jax.nn.sigmoid(gates[:, 1 * H:2 * H])
        g = jnp.tanh(gates[:, 2 * H:3 * H])
        o = jax.nn.sigmoid(gates[:, 3 * H:4 * H])
        c = f * c + i * g
        h = o * jnp.tanh(c)
        outs.append(h)
    return jnp.stack(outs, axis=1), h


if __name__ == "__main__":
    batch = 2
    seq_len = 8
    input_size = 16
    hidden_size = 32

    key = jax.random.PRNGKey(0)
    k_x, k_p = jax.random.split(key)
    x = jax.random.normal(k_x, (batch, seq_len, input_size), dtype=jnp.float32)
    params = init_lstm_params(k_p, input_size, hidden_size)
    packed = pack_lstm_params(params, hidden_size)   # one-time, outside the forward path

    out, h_last = lstm_encoder_forward(x, packed)
    jax.block_until_ready((out, h_last))

    out_ref, h_ref = _ref_lstm(x, params)
    assert out.shape == (batch, seq_len, hidden_size)
    assert h_last.shape == (batch, hidden_size)
    assert jnp.allclose(out, out_ref, atol=1e-5), "out mismatch"
    assert jnp.allclose(h_last, h_ref, atol=1e-5), "h_last mismatch"
    # h[-1] must equal the last timestep of out for a single-layer LSTM.
    assert jnp.allclose(h_last, out[:, -1, :], atol=1e-6), "h_last != out[:, -1]"

    print("KERNEL_OK")
</pallas_src>

<mosaic_0001>
module attributes {stable_mosaic.version = 11 : i64} {
  func.func @_lstm_encoder_kernel(%arg0: memref<2x8x16xf32, #tpu.memory_space<vmem>>, %arg1: memref<16x512xf32, #tpu.memory_space<vmem>>, %arg2: memref<128x512xf32, #tpu.memory_space<vmem>>, %arg3: memref<1x512xf32, #tpu.memory_space<vmem>>, %arg4: memref<2x8x128xf32, #tpu.memory_space<vmem>>, %arg5: memref<2x128xf32, #tpu.memory_space<vmem>>) attributes {dimension_semantics = [], scalar_prefetch = 0 : i64, scratch_operands = 0 : i64, tpu.core_type = #tpu.core_type<tc>} {
    %c0 = arith.constant 0 : index
    %c0_0 = arith.constant 0 : index
    %0 = vector.load %arg1[%c0, %c0_0] : memref<16x512xf32, #tpu.memory_space<vmem>>, vector<16x512xf32>
    %c0_1 = arith.constant 0 : index
    %c0_2 = arith.constant 0 : index
    %1 = vector.load %arg2[%c0_1, %c0_2] : memref<128x512xf32, #tpu.memory_space<vmem>>, vector<128x512xf32>
    %c0_3 = arith.constant 0 : index
    %c0_4 = arith.constant 0 : index
    %2 = vector.load %arg3[%c0_3, %c0_4] : memref<1x512xf32, #tpu.memory_space<vmem>>, vector<1x512xf32>
    %c0_5 = arith.constant 0 : index
    %c0_6 = arith.constant 0 : index
    %c0_7 = arith.constant 0 : index
    %3 = vector.load %arg0[%c0_5, %c0_6, %c0_7] : memref<2x8x16xf32, #tpu.memory_space<vmem>>, vector<2x8x16xf32>
    %4 = vector.shape_cast %3 : vector<2x8x16xf32> to vector<16x16xf32>
    %cst = arith.constant dense<0.000000e+00> : vector<16x512xf32>
    %5 = tpu.matmul %4, %0, %cst {dimension_numbers = #tpu.dot_dimension_numbers<[1], [0], [0], [1], [0, 0, 1, 1], [], []>} : vector<16x16xf32>, vector<16x512xf32>, vector<16x512xf32> -> vector<16x512xf32>
    %6 = vector.broadcast %2 : vector<1x512xf32> to vector<16x512xf32>
    %7 = arith.addf %5, %6 : vector<16x512xf32>
    %8 = vector.shape_cast %7 : vector<16x512xf32> to vector<2x8x512xf32>
    %cst_8 = arith.constant 0.000000e+00 : f32
    %9 = vector.broadcast %cst_8 : f32 to vector<2x128xf32>
    %cst_9 = arith.constant 0.000000e+00 : f32
    %10 = vector.broadcast %cst_9 : f32 to vector<2x128xf32>
    %11 = vector.extract_strided_slice %8 {offsets = [0, 0, 0], sizes = [2, 1, 512], strides = [1, 1, 1]} : vector<2x8x512xf32> to vector<2x1x512xf32>
    %12 = vector.shape_cast %11 : vector<2x1x512xf32> to vector<2x512xf32>
    %cst_10 = arith.constant dense<0.000000e+00> : vector<2x512xf32>
    %13 = tpu.matmul %9, %1, %cst_10 {dimension_numbers = #tpu.dot_dimension_numbers<[1], [0], [0], [1], [0, 0, 1, 1], [], []>} : vector<2x128xf32>, vector<128x512xf32>, vector<2x512xf32> -> vector<2x512xf32>
    %14 = arith.addf %12, %13 : vector<2x512xf32>
    %15 = vector.extract_strided_slice %14 {offsets = [0, 0], sizes = [2, 128], strides = [1, 1]} : vector<2x512xf32> to vector<2x128xf32>
    %16 = arith.negf %15 : vector<2x128xf32>
    %17 = math.exp %16 : vector<2x128xf32>
    %cst_11 = arith.constant 1.000000e+00 : f32
    %18 = vector.broadcast %cst_11 : f32 to vector<2x128xf32>
    %19 = arith.addf %18, %17 : vector<2x128xf32>
    %20 = arith.divf %18, %19 : vector<2x128xf32>
    %21 = vector.extract_strided_slice %14 {offsets = [0, 128], sizes = [2, 128], strides = [1, 1]} : vector<2x512xf32> to vector<2x128xf32>
    %22 = arith.negf %21 : vector<2x128xf32>
    %23 = math.exp %22 : vector<2x128xf32>
    %cst_12 = arith.constant 1.000000e+00 : f32
    %24 = vector.broadcast %cst_12 : f32 to vector<2x128xf32>
    %25 = arith.addf %24, %23 : vector<2x128xf32>
    %26 = arith.divf %24, %25 : vector<2x128xf32>
    %27 = vector.extract_strided_slice %14 {offsets = [0, 256], sizes = [2, 128], strides = [1, 1]} : vector<2x512xf32> to vector<2x128xf32>
    %28 = math.tanh %27 : vector<2x128xf32>
    %29 = vector.extract_strided_slice %14 {offsets = [0, 384], sizes = [2, 128], strides = [1, 1]} : vector<2x512xf32> to vector<2x128xf32>
    %30 = arith.negf %29 : vector<2x128xf32>
    %31 = math.exp %30 : vector<2x128xf32>
    %cst_13 = arith.constant 1.000000e+00 : f32
    %32 = vector.broadcast %cst_13 : f32 to vector<2x128xf32>
    %33 = arith.addf %32, %31 : vector<2x128xf32>
    %34 = arith.divf %32, %33 : vector<2x128xf32>
    %35 = arith.mulf %26, %10 : vector<2x128xf32>
    %36 = arith.mulf %20, %28 : vector<2x128xf32>
    %37 = arith.addf %35, %36 : vector<2x128xf32>
    %38 = math.tanh %37 : vector<2x128xf32>
    %39 = arith.mulf %34, %38 : vector<2x128xf32>
    %c0_14 = arith.constant 0 : index
    %c0_15 = arith.constant 0 : index
    %c0_16 = arith.constant 0 : index
    %40 = vector.load %arg4[%c0_14, %c0_15, %c0_16] : memref<2x8x128xf32, #tpu.memory_space<vmem>>, vector<2x1x128xf32>
    %41 = vector.shape_cast %40 : vector<2x1x128xf32> to vector<2x128xf32>
    %42 = vector.shape_cast %39 : vector<2x128xf32> to vector<2x1x128xf32>
    tpu.vector_store %arg4[%c0_14, %c0_15, %c0_16], %42 {strides = array<i32>} : memref<2x8x128xf32, #tpu.memory_space<vmem>>, vector<2x1x128xf32>,
    %43 = vector.extract_strided_slice %8 {offsets = [0, 1, 0], sizes = [2, 1, 512], strides = [1, 1, 1]} : vector<2x8x512xf32> to vector<2x1x512xf32>
    %44 = vector.shape_cast %43 : vector<2x1x512xf32> to vector<2x512xf32>
    %cst_17 = arith.constant dense<0.000000e+00> : vector<2x512xf32>
    %45 = tpu.matmul %39, %1, %cst_17 {dimension_numbers = #tpu.dot_dimension_numbers<[1], [0], [0], [1], [0, 0, 1, 1], [], []>} : vector<2x128xf32>, vector<128x512xf32>, vector<2x512xf32> -> vector<2x512xf32>
    %46 = arith.addf %44, %45 : vector<2x512xf32>
    %47 = vector.extract_strided_slice %46 {offsets = [0, 0], sizes = [2, 128], strides = [1, 1]} : vector<2x512xf32> to vector<2x128xf32>
    %48 = arith.negf %47 : vector<2x128xf32>
    %49 = math.exp %48 : vector<2x128xf32>
    %cst_18 = arith.constant 1.000000e+00 : f32
    %50 = vector.broadcast %cst_18 : f32 to vector<2x128xf32>
    %51 = arith.addf %50, %49 : vector<2x128xf32>
    %52 = arith.divf %50, %51 : vector<2x128xf32>
    %53 = vector.extract_strided_slice %46 {offsets = [0, 128], sizes = [2, 128], strides = [1, 1]} : vector<2x512xf32> to vector<2x128xf32>
    %54 = arith.negf %53 : vector<2x128xf32>
    %55 = math.exp %54 : vector<2x128xf32>
    %cst_19 = arith.constant 1.000000e+00 : f32
    %56 = vector.broadcast %cst_19 : f32 to vector<2x128xf32>
    %57 = arith.addf %56, %55 : vector<2x128xf32>
    %58 = arith.divf %56, %57 : vector<2x128xf32>
    %59 = vector.extract_strided_slice %46 {offsets = [0, 256], sizes = [2, 128], strides = [1, 1]} : vector<2x512xf32> to vector<2x128xf32>
    %60 = math.tanh %59 : vector<2x128xf32>
    %61 = vector.extract_strided_slice %46 {offsets = [0, 384], sizes = [2, 128], strides = [1, 1]} : vector<2x512xf32> to vector<2x128xf32>
    %62 = arith.negf %61 : vector<2x128xf32>
    %63 = math.exp %62 : vector<2x128xf32>
    %cst_20 = arith.constant 1.000000e+00 : f32
    %64 = vector.broadcast %cst_20 : f32 to vector<2x128xf32>
    %65 = arith.addf %64, %63 : vector<2x128xf32>
    %66 = arith.divf %64, %65 : vector<2x128xf32>
    %67 = arith.mulf %58, %37 : vector<2x128xf32>
    %68 = arith.mulf %52, %60 : vector<2x128xf32>
    %69 = arith.addf %67, %68 : vector<2x128xf32>
    %70 = math.tanh %69 : vector<2x128xf32>
    %71 = arith.mulf %66, %70 : vector<2x128xf32>
    %c0_21 = arith.constant 0 : index
    %c1 = arith.constant 1 : index
    %c0_22 = arith.constant 0 : index
    %72 = vector.load %arg4[%c0_21, %c1, %c0_22] : memref<2x8x128xf32, #tpu.memory_space<vmem>>, vector<2x1x128xf32>
    %73 = vector.shape_cast %72 : vector<2x1x128xf32> to vector<2x128xf32>
    %74 = vector.shape_cast %71 : vector<2x128xf32> to vector<2x1x128xf32>
    tpu.vector_store %arg4[%c0_21, %c1, %c0_22], %74 {strides = array<i32>} : memref<2x8x128xf32, #tpu.memory_space<vmem>>, vector<2x1x128xf32>,
    %75 = vector.extract_strided_slice %8 {offsets = [0, 2, 0], sizes = [2, 1, 512], strides = [1, 1, 1]} : vector<2x8x512xf32> to vector<2x1x512xf32>
    %76 = vector.shape_cast %75 : vector<2x1x512xf32> to vector<2x512xf32>
    %cst_23 = arith.constant dense<0.000000e+00> : vector<2x512xf32>
    %77 = tpu.matmul %71, %1, %cst_23 {dimension_numbers = #tpu.dot_dimension_numbers<[1], [0], [0], [1], [0, 0, 1, 1], [], []>} : vector<2x128xf32>, vector<128x512xf32>, vector<2x512xf32> -> vector<2x512xf32>
    %78 = arith.addf %76, %77 : vector<2x512xf32>
    %79 = vector.extract_strided_slice %78 {offsets = [0, 0], sizes = [2, 128], strides = [1, 1]} : vector<2x512xf32> to vector<2x128xf32>
    %80 = arith.negf %79 : vector<2x128xf32>
    %81 = math.exp %80 : vector<2x128xf32>
    %cst_24 = arith.constant 1.000000e+00 : f32
    %82 = vector.broadcast %cst_24 : f32 to vector<2x128xf32>
    %83 = arith.addf %82, %81 : vector<2x128xf32>
    %84 = arith.divf %82, %83 : vector<2x128xf32>
    %85 = vector.extract_strided_slice %78 {offsets = [0, 128], sizes = [2, 128], strides = [1, 1]} : vector<2x512xf32> to vector<2x128xf32>
    %86 = arith.negf %85 : vector<2x128xf32>
    %87 = math.exp %86 : vector<2x128xf32>
    %cst_25 = arith.constant 1.000000e+00 : f32
    %88 = vector.broadcast %cst_25 : f32 to vector<2x128xf32>
    %89 = arith.addf %88, %87 : vector<2x128xf32>
    %90 = arith.divf %88, %89 : vector<2x128xf32>
    %91 = vector.extract_strided_slice %78 {offsets = [0, 256], sizes = [2, 128], strides = [1, 1]} : vector<2x512xf32> to vector<2x128xf32>
    %92 = math.tanh %91 : vector<2x128xf32>
    %93 = vector.extract_strided_slice %78 {offsets = [0, 384], sizes = [2, 128], strides = [1, 1]} : vector<2x512xf32> to vector<2x128xf32>
    %94 = arith.negf %93 : vector<2x128xf32>
    %95 = math.exp %94 : vector<2x128xf32>
    %cst_26 = arith.constant 1.000000e+00 : f32
    %96 = vector.broadcast %cst_26 : f32 to vector<2x128xf32>
    %97 = arith.addf %96, %95 : vector<2x128xf32>
    %98 = arith.divf %96, %97 : vector<2x128xf32>
    %99 = arith.mulf %90, %69 : vector<2x128xf32>
    %100 = arith.mulf %84, %92 : vector<2x128xf32>
    %101 = arith.addf %99, %100 : vector<2x128xf32>
    %102 = math.tanh %101 : vector<2x128xf32>
    %103 = arith.mulf %98, %102 : vector<2x128xf32>
    %c0_27 = arith.constant 0 : index
    %c2 = arith.constant 2 : index
    %c0_28 = arith.constant 0 : index
    %104 = vector.load %arg4[%c0_27, %c2, %c0_28] : memref<2x8x128xf32, #tpu.memory_space<vmem>>, vector<2x1x128xf32>
    %105 = vector.shape_cast %104 : vector<2x1x128xf32> to vector<2x128xf32>
    %106 = vector.shape_cast %103 : vector<2x128xf32> to vector<2x1x128xf32>
    tpu.vector_store %arg4[%c0_27, %c2, %c0_28], %106 {strides = array<i32>} : memref<2x8x128xf32, #tpu.memory_space<vmem>>, vector<2x1x128xf32>,
    %107 = vector.extract_strided_slice %8 {offsets = [0, 3, 0], sizes = [2, 1, 512], strides = [1, 1, 1]} : vector<2x8x512xf32> to vector<2x1x512xf32>
    %108 = vector.shape_cast %107 : vector<2x1x512xf32> to vector<2x512xf32>
    %cst_29 = arith.constant dense<0.000000e+00> : vector<2x512xf32>
    %109 = tpu.matmul %103, %1, %cst_29 {dimension_numbers = #tpu.dot_dimension_numbers<[1], [0], [0], [1], [0, 0, 1, 1], [], []>} : vector<2x128xf32>, vector<128x512xf32>, vector<2x512xf32> -> vector<2x512xf32>
    %110 = arith.addf %108, %109 : vector<2x512xf32>
    %111 = vector.extract_strided_slice %110 {offsets = [0, 0], sizes = [2, 128], strides = [1, 1]} : vector<2x512xf32> to vector<2x128xf32>
    %112 = arith.negf %111 : vector<2x128xf32>
    %113 = math.exp %112 : vector<2x128xf32>
    %cst_30 = arith.constant 1.000000e+00 : f32
    %114 = vector.broadcast %cst_30 : f32 to vector<2x128xf32>
    %115 = arith.addf %114, %113 : vector<2x128xf32>
    %116 = arith.divf %114, %115 : vector<2x128xf32>
    %117 = vector.extract_strided_slice %110 {offsets = [0, 128], sizes = [2, 128], strides = [1, 1]} : vector<2x512xf32> to vector<2x128xf32>
    %118 = arith.negf %117 : vector<2x128xf32>
    %119 = math.exp %118 : vector<2x128xf32>
    %cst_31 = arith.constant 1.000000e+00 : f32
    %120 = vector.broadcast %cst_31 : f32 to vector<2x128xf32>
    %121 = arith.addf %120, %119 : vector<2x128xf32>
    %122 = arith.divf %120, %121 : vector<2x128xf32>
    %123 = vector.extract_strided_slice %110 {offsets = [0, 256], sizes = [2, 128], strides = [1, 1]} : vector<2x512xf32> to vector<2x128xf32>
    %124 = math.tanh %123 : vector<2x128xf32>
    %125 = vector.extract_strided_slice %110 {offsets = [0, 384], sizes = [2, 128], strides = [1, 1]} : vector<2x512xf32> to vector<2x128xf32>
    %126 = arith.negf %125 : vector<2x128xf32>
    %127 = math.exp %126 : vector<2x128xf32>
    %cst_32 = arith.constant 1.000000e+00 : f32
    %128 = vector.broadcast %cst_32 : f32 to vector<2x128xf32>
    %129 = arith.addf %128, %127 : vector<2x128xf32>
    %130 = arith.divf %128, %129 : vector<2x128xf32>
    %131 = arith.mulf %122, %101 : vector<2x128xf32>
    %132 = arith.mulf %116, %124 : vector<2x128xf32>
    %133 = arith.addf %131, %132 : vector<2x128xf32>
    %134 = math.tanh %133 : vector<2x128xf32>
    %135 = arith.mulf %130, %134 : vector<2x128xf32>
    %c0_33 = arith.constant 0 : index
    %c3 = arith.constant 3 : index
    %c0_34 = arith.constant 0 : index
    %136 = vector.load %arg4[%c0_33, %c3, %c0_34] : memref<2x8x128xf32, #tpu.memory_space<vmem>>, vector<2x1x128xf32>
    %137 = vector.shape_cast %136 : vector<2x1x128xf32> to vector<2x128xf32>
    %138 = vector.shape_cast %135 : vector<2x128xf32> to vector<2x1x128xf32>
    tpu.vector_store %arg4[%c0_33, %c3, %c0_34], %138 {strides = array<i32>} : memref<2x8x128xf32, #tpu.memory_space<vmem>>, vector<2x1x128xf32>,
    %139 = vector.extract_strided_slice %8 {offsets = [0, 4, 0], sizes = [2, 1, 512], strides = [1, 1, 1]} : vector<2x8x512xf32> to vector<2x1x512xf32>
    %140 = vector.shape_cast %139 : vector<2x1x512xf32> to vector<2x512xf32>
    %cst_35 = arith.constant dense<0.000000e+00> : vector<2x512xf32>
    %141 = tpu.matmul %135, %1, %cst_35 {dimension_numbers = #tpu.dot_dimension_numbers<[1], [0], [0], [1], [0, 0, 1, 1], [], []>} : vector<2x128xf32>, vector<128x512xf32>, vector<2x512xf32> -> vector<2x512xf32>
    %142 = arith.addf %140, %141 : vector<2x512xf32>
    %143 = vector.extract_strided_slice %142 {offsets = [0, 0], sizes = [2, 128], strides = [1, 1]} : vector<2x512xf32> to vector<2x128xf32>
    %144 = arith.negf %143 : vector<2x128xf32>
    %145 = math.exp %144 : vector<2x128xf32>
    %cst_36 = arith.constant 1.000000e+00 : f32
    %146 = vector.broadcast %cst_36 : f32 to vector<2x128xf32>
    %147 = arith.addf %146, %145 : vector<2x128xf32>
    %148 = arith.divf %146, %147 : vector<2x128xf32>
    %149 = vector.extract_strided_slice %142 {offsets = [0, 128], sizes = [2, 128], strides = [1, 1]} : vector<2x512xf32> to vector<2x128xf32>
    %150 = arith.negf %149 : vector<2x128xf32>
    %151 = math.exp %150 : vector<2x128xf32>
    %cst_37 = arith.constant 1.000000e+00 : f32
    %152 = vector.broadcast %cst_37 : f32 to vector<2x128xf32>
    %153 = arith.addf %152, %151 : vector<2x128xf32>
    %154 = arith.divf %152, %153 : vector<2x128xf32>
    %155 = vector.extract_strided_slice %142 {offsets = [0, 256], sizes = [2, 128], strides = [1, 1]} : vector<2x512xf32> to vector<2x128xf32>
    %156 = math.tanh %155 : vector<2x128xf32>
    %157 = vector.extract_strided_slice %142 {offsets = [0, 384], sizes = [2, 128], strides = [1, 1]} : vector<2x512xf32> to vector<2x128xf32>
    %158 = arith.negf %157 : vector<2x128xf32>
    %159 = math.exp %158 : vector<2x128xf32>
    %cst_38 = arith.constant 1.000000e+00 : f32
    %160 = vector.broadcast %cst_38 : f32 to vector<2x128xf32>
    %161 = arith.addf %160, %159 : vector<2x128xf32>
    %162 = arith.divf %160, %161 : vector<2x128xf32>
    %163 = arith.mulf %154, %133 : vector<2x128xf32>
    %164 = arith.mulf %148, %156 : vector<2x128xf32>
    %165 = arith.addf %163, %164 : vector<2x128xf32>
    %166 = math.tanh %165 : vector<2x128xf32>
    %167 = arith.mulf %162, %166 : vector<2x128xf32>
    %c0_39 = arith.constant 0 : index
    %c4 = arith.constant 4 : index
    %c0_40 = arith.constant 0 : index
    %168 = vector.load %arg4[%c0_39, %c4, %c0_40] : memref<2x8x128xf32, #tpu.memory_space<vmem>>, vector<2x1x128xf32>
    %169 = vector.shape_cast %168 : vector<2x1x128xf32> to vector<2x128xf32>
    %170 = vector.shape_cast %167 : vector<2x128xf32> to vector<2x1x128xf32>
    tpu.vector_store %arg4[%c0_39, %c4, %c0_40], %170 {strides = array<i32>} : memref<2x8x128xf32, #tpu.memory_space<vmem>>, vector<2x1x128xf32>,
    %171 = vector.extract_strided_slice %8 {offsets = [0, 5, 0], sizes = [2, 1, 512], strides = [1, 1, 1]} : vector<2x8x512xf32> to vector<2x1x512xf32>
    %172 = vector.shape_cast %171 : vector<2x1x512xf32> to vector<2x512xf32>
    %cst_41 = arith.constant dense<0.000000e+00> : vector<2x512xf32>
    %173 = tpu.matmul %167, %1, %cst_41 {dimension_numbers = #tpu.dot_dimension_numbers<[1], [0], [0], [1], [0, 0, 1, 1], [], []>} : vector<2x128xf32>, vector<128x512xf32>, vector<2x512xf32> -> vector<2x512xf32>
    %174 = arith.addf %172, %173 : vector<2x512xf32>
    %175 = vector.extract_strided_slice %174 {offsets = [0, 0], sizes = [2, 128], strides = [1, 1]} : vector<2x512xf32> to vector<2x128xf32>
    %176 = arith.negf %175 : vector<2x128xf32>
    %177 = math.exp %176 : vector<2x128xf32>
    %cst_42 = arith.constant 1.000000e+00 : f32
    %178 = vector.broadcast %cst_42 : f32 to vector<2x128xf32>
    %179 = arith.addf %178, %177 : vector<2x128xf32>
    %180 = arith.divf %178, %179 : vector<2x128xf32>
    %181 = vector.extract_strided_slice %174 {offsets = [0, 128], sizes = [2, 128], strides = [1, 1]} : vector<2x512xf32> to vector<2x128xf32>
    %182 = arith.negf %181 : vector<2x128xf32>
    %183 = math.exp %182 : vector<2x128xf32>
    %cst_43 = arith.constant 1.000000e+00 : f32
    %184 = vector.broadcast %cst_43 : f32 to vector<2x128xf32>
    %185 = arith.addf %184, %183 : vector<2x128xf32>
    %186 = arith.divf %184, %185 : vector<2x128xf32>
    %187 = vector.extract_strided_slice %174 {offsets = [0, 256], sizes = [2, 128], strides = [1, 1]} : vector<2x512xf32> to vector<2x128xf32>
    %188 = math.tanh %187 : vector<2x128xf32>
    %189 = vector.extract_strided_slice %174 {offsets = [0, 384], sizes = [2, 128], strides = [1, 1]} : vector<2x512xf32> to vector<2x128xf32>
    %190 = arith.negf %189 : vector<2x128xf32>
    %191 = math.exp %190 : vector<2x128xf32>
    %cst_44 = arith.constant 1.000000e+00 : f32
    %192 = vector.broadcast %cst_44 : f32 to vector<2x128xf32>
    %193 = arith.addf %192, %191 : vector<2x128xf32>
    %194 = arith.divf %192, %193 : vector<2x128xf32>
    %195 = arith.mulf %186, %165 : vector<2x128xf32>
    %196 = arith.mulf %180, %188 : vector<2x128xf32>
    %197 = arith.addf %195, %196 : vector<2x128xf32>
    %198 = math.tanh %197 : vector<2x128xf32>
    %199 = arith.mulf %194, %198 : vector<2x128xf32>
    %c0_45 = arith.constant 0 : index
    %c5 = arith.constant 5 : index
    %c0_46 = arith.constant 0 : index
    %200 = vector.load %arg4[%c0_45, %c5, %c0_46] : memref<2x8x128xf32, #tpu.memory_space<vmem>>, vector<2x1x128xf32>
    %201 = vector.shape_cast %200 : vector<2x1x128xf32> to vector<2x128xf32>
    %202 = vector.shape_cast %199 : vector<2x128xf32> to vector<2x1x128xf32>
    tpu.vector_store %arg4[%c0_45, %c5, %c0_46], %202 {strides = array<i32>} : memref<2x8x128xf32, #tpu.memory_space<vmem>>, vector<2x1x128xf32>,
    %203 = vector.extract_strided_slice %8 {offsets = [0, 6, 0], sizes = [2, 1, 512], strides = [1, 1, 1]} : vector<2x8x512xf32> to vector<2x1x512xf32>
    %204 = vector.shape_cast %203 : vector<2x1x512xf32> to vector<2x512xf32>
    %cst_47 = arith.constant dense<0.000000e+00> : vector<2x512xf32>
    %205 = tpu.matmul %199, %1, %cst_47 {dimension_numbers = #tpu.dot_dimension_numbers<[1], [0], [0], [1], [0, 0, 1, 1], [], []>} : vector<2x128xf32>, vector<128x512xf32>, vector<2x512xf32> -> vector<2x512xf32>
    %206 = arith.addf %204, %205 : vector<2x512xf32>
    %207 = vector.extract_strided_slice %206 {offsets = [0, 0], sizes = [2, 128], strides = [1, 1]} : vector<2x512xf32> to vector<2x128xf32>
    %208 = arith.negf %207 : vector<2x128xf32>
    %209 = math.exp %208 : vector<2x128xf32>
    %cst_48 = arith.constant 1.000000e+00 : f32
    %210 = vector.broadcast %cst_48 : f32 to vector<2x128xf32>
    %211 = arith.addf %210, %209 : vector<2x128xf32>
    %212 = arith.divf %210, %211 : vector<2x128xf32>
    %213 = vector.extract_strided_slice %206 {offsets = [0, 128], sizes = [2, 128], strides = [1, 1]} : vector<2x512xf32> to vector<2x128xf32>
    %214 = arith.negf %213 : vector<2x128xf32>
    %215 = math.exp %214 : vector<2x128xf32>
    %cst_49 = arith.constant 1.000000e+00 : f32
    %216 = vector.broadcast %cst_49 : f32 to vector<2x128xf32>
    %217 = arith.addf %216, %215 : vector<2x128xf32>
    %218 = arith.divf %216, %217 : vector<2x128xf32>
    %219 = vector.extract_strided_slice %206 {offsets = [0, 256], sizes = [2, 128], strides = [1, 1]} : vector<2x512xf32> to vector<2x128xf32>
    %220 = math.tanh %219 : vector<2x128xf32>
    %221 = vector.extract_strided_slice %206 {offsets = [0, 384], sizes = [2, 128], strides = [1, 1]} : vector<2x512xf32> to vector<2x128xf32>
    %222 = arith.negf %221 : vector<2x128xf32>
    %223 = math.exp %222 : vector<2x128xf32>
    %cst_50 = arith.constant 1.000000e+00 : f32
    %224 = vector.broadcast %cst_50 : f32 to vector<2x128xf32>
    %225 = arith.addf %224, %223 : vector<2x128xf32>
    %226 = arith.divf %224, %225 : vector<2x128xf32>
    %227 = arith.mulf %218, %197 : vector<2x128xf32>
    %228 = arith.mulf %212, %220 : vector<2x128xf32>
    %229 = arith.addf %227, %228 : vector<2x128xf32>
    %230 = math.tanh %229 : vector<2x128xf32>
    %231 = arith.mulf %226, %230 : vector<2x128xf32>
    %c0_51 = arith.constant 0 : index
    %c6 = arith.constant 6 : index
    %c0_52 = arith.constant 0 : index
    %232 = vector.load %arg4[%c0_51, %c6, %c0_52] : memref<2x8x128xf32, #tpu.memory_space<vmem>>, vector<2x1x128xf32>
    %233 = vector.shape_cast %232 : vector<2x1x128xf32> to vector<2x128xf32>
    %234 = vector.shape_cast %231 : vector<2x128xf32> to vector<2x1x128xf32>
    tpu.vector_store %arg4[%c0_51, %c6, %c0_52], %234 {strides = array<i32>} : memref<2x8x128xf32, #tpu.memory_space<vmem>>, vector<2x1x128xf32>,
    %235 = vector.extract_strided_slice %8 {offsets = [0, 7, 0], sizes = [2, 1, 512], strides = [1, 1, 1]} : vector<2x8x512xf32> to vector<2x1x512xf32>
    %236 = vector.shape_cast %235 : vector<2x1x512xf32> to vector<2x512xf32>
    %cst_53 = arith.constant dense<0.000000e+00> : vector<2x512xf32>
    %237 = tpu.matmul %231, %1, %cst_53 {dimension_numbers = #tpu.dot_dimension_numbers<[1], [0], [0], [1], [0, 0, 1, 1], [], []>} : vector<2x128xf32>, vector<128x512xf32>, vector<2x512xf32> -> vector<2x512xf32>
    %238 = arith.addf %236, %237 : vector<2x512xf32>
    %239 = vector.extract_strided_slice %238 {offsets = [0, 0], sizes = [2, 128], strides = [1, 1]} : vector<2x512xf32> to vector<2x128xf32>
    %240 = arith.negf %239 : vector<2x128xf32>
    %241 = math.exp %240 : vector<2x128xf32>
    %cst_54 = arith.constant 1.000000e+00 : f32
    %242 = vector.broadcast %cst_54 : f32 to vector<2x128xf32>
    %243 = arith.addf %242, %241 : vector<2x128xf32>
    %244 = arith.divf %242, %243 : vector<2x128xf32>
    %245 = vector.extract_strided_slice %238 {offsets = [0, 128], sizes = [2, 128], strides = [1, 1]} : vector<2x512xf32> to vector<2x128xf32>
    %246 = arith.negf %245 : vector<2x128xf32>
    %247 = math.exp %246 : vector<2x128xf32>
    %cst_55 = arith.constant 1.000000e+00 : f32
    %248 = vector.broadcast %cst_55 : f32 to vector<2x128xf32>
    %249 = arith.addf %248, %247 : vector<2x128xf32>
    %250 = arith.divf %248, %249 : vector<2x128xf32>
    %251 = vector.extract_strided_slice %238 {offsets = [0, 256], sizes = [2, 128], strides = [1, 1]} : vector<2x512xf32> to vector<2x128xf32>
    %252 = math.tanh %251 : vector<2x128xf32>
    %253 = vector.extract_strided_slice %238 {offsets = [0, 384], sizes = [2, 128], strides = [1, 1]} : vector<2x512xf32> to vector<2x128xf32>
    %254 = arith.negf %253 : vector<2x128xf32>
    %255 = math.exp %254 : vector<2x128xf32>
    %cst_56 = arith.constant 1.000000e+00 : f32
    %256 = vector.broadcast %cst_56 : f32 to vector<2x128xf32>
    %257 = arith.addf %256, %255 : vector<2x128xf32>
    %258 = arith.divf %256, %257 : vector<2x128xf32>
    %259 = arith.mulf %250, %229 : vector<2x128xf32>
    %260 = arith.mulf %244, %252 : vector<2x128xf32>
    %261 = arith.addf %259, %260 : vector<2x128xf32>
    %262 = math.tanh %261 : vector<2x128xf32>
    %263 = arith.mulf %258, %262 : vector<2x128xf32>
    %c0_57 = arith.constant 0 : index
    %c7 = arith.constant 7 : index
    %c0_58 = arith.constant 0 : index
    %264 = vector.load %arg4[%c0_57, %c7, %c0_58] : memref<2x8x128xf32, #tpu.memory_space<vmem>>, vector<2x1x128xf32>
    %265 = vector.shape_cast %264 : vector<2x1x128xf32> to vector<2x128xf32>
    %266 = vector.shape_cast %263 : vector<2x128xf32> to vector<2x1x128xf32>
    tpu.vector_store %arg4[%c0_57, %c7, %c0_58], %266 {strides = array<i32>} : memref<2x8x128xf32, #tpu.memory_space<vmem>>, vector<2x1x128xf32>,
    %c0_59 = arith.constant 0 : index
    %c0_60 = arith.constant 0 : index
    %267 = vector.load %arg5[%c0_59, %c0_60] : memref<2x128xf32, #tpu.memory_space<vmem>>, vector<2x128xf32>
    tpu.vector_store %arg5[%c0_59, %c0_60], %263 {strides = array<i32>} : memref<2x128xf32, #tpu.memory_space<vmem>>, vector<2x128xf32>,
    return
  }
}

</mosaic_0001>

<bundles_post_ra>
// kernel: tpu_custom_call.1
= control target key start
LH: loop header
LB: loop body
LE: loop exit
PB: predicated region body
PF: predicated region fallthrough
CT: control target
= control target key end

     0   :  { %11 = vsyncpa [#allocation3], 0  ;;  %s3753_s0 = inlined_call_operand.hbm [shape: f32[2,8,16], index: 0, kind: input, shape index: {}]   ;;  %s3754_s1 = inlined_call_operand.hbm [shape: f32[16,512], index: 1, kind: input, shape index: {}]   ;;  %s3755_s2 = inlined_call_operand.hbm [shape: f32[128,512], index: 2, kind: input, shape index: {}]   ;;  %s3756_s3 = inlined_call_operand.vmem [shape: f32[1,512], index: 3, kind: input, shape index: {}]   ;;  %s3757_s4 = inlined_call_operand.hbm [shape: f32[2,8,128], index: 4, kind: output, shape index: {0}]   ;;  %s3758_s5 = inlined_call_operand.hbm [shape: f32[2,128], index: 5, kind: output, shape index: {1}]  }
   0x1   :  { %12 = vsyncpa [#allocation6], 0 }
   0x2   :  { %13 = vsyncpa [#allocation4], 0 }
   0x3   :  { %14 = vsyncpa [#allocation10], 0  ;;  %s3149_s18 = smov [#allocation5]   ;;  %s3031_s22 = scalar_lea.hbm %s3754_s1, 1024 }
   0x4   :  { %s32_s19 = sshll.u32 %s3149_s18, 4  ;;  %p3032_p0 = scmp.ne.s32.totalorder %s3754_s1, %s3031_s22  ;;  %s33_s19 = int_to_ptr.vmem [resolvable:$true] %s32_s19 }
   0x5   :  { %p3035_p1 = scmp.lt.u32.totalorder %s3031_s22, %s3754_s1 }
   0x7   :  { %p3037_p2 = pnand %p3035_p1, %p3032_p0 }
   0x9   :  { %3040 = shalt.err (!%p3037_p2)
}
   0xa   :  { %s3041_s27 = scalar_lea.vmem %s33_s19, 1024  ;;  %p3046_p4 = scmp.lt.s32.totalorder %s33_s19, %s33_s19 }
   0xb   :  { %p3042_p3 = scmp.ne.s32.totalorder %s33_s19, %s3041_s27  ;;  %p3047_p5 = scmp.lt.s32.totalorder %s3041_s27, %s3041_s27 }
   0xd   :  { %p3048_p6 = por %p3047_p5, %p3046_p4 }
   0xf   :  { %p3049_p7 = pnand %p3048_p6, %p3042_p3 }
  0x11   :  { %3052 = shalt.err (!%p3049_p7)
}
  0x12   :  { %s3150_s28 = smov 512   ;;  %s3151_s29 = smov 32  }
  0x13   :  { %38 = dma.hbm_to_vmem [thread:$0]  %s3754_s1, 1024, %s33_s19, [#allocation6], %s3150_s28, %s3150_s28, %s3151_s29  }
  0x14   :  { %s3152_s7 = smov [#allocation2]   ;;  %s3053_s11 = scalar_lea.hbm %s3753_s0, 256 }
  0x15   :  { %s20_s8 = sshll.u32 %s3152_s7, 4  ;;  %p3054_p8 = scmp.ne.s32.totalorder %s3753_s0, %s3053_s11  ;;  %s21_s8 = int_to_ptr.vmem [resolvable:$true] %s20_s8 }
  0x16   :  { %p3057_p9 = scmp.lt.u32.totalorder %s3053_s11, %s3753_s0 }
  0x18   :  { %p3059_p10 = pnand %p3057_p9, %p3054_p8 }
  0x1a   :  { %3062 = shalt.err (!%p3059_p10)
}
  0x1b   :  { %s3063_s16 = scalar_lea.vmem %s21_s8, 256  ;;  %p3068_p12 = scmp.lt.s32.totalorder %s21_s8, %s21_s8 }
  0x1c   :  { %p3064_p11 = scmp.ne.s32.totalorder %s21_s8, %s3063_s16  ;;  %p3069_p13 = scmp.lt.s32.totalorder %s3063_s16, %s3063_s16 }
  0x1e   :  { %p3070_p0 = por %p3069_p13, %p3068_p12 }
  0x20   :  { %p3071_p1 = pnand %p3070_p0, %p3064_p11 }
  0x22   :  { %3074 = shalt.err (!%p3071_p1)
}
  0x23   :  { %s3153_s1 = smov 128   ;;  %s3154_s17 = smov 8  }
  0x24   :  { %26 = dma.hbm_to_vmem [thread:$0]  %s3753_s0, 256, %s21_s8, [#allocation3], %s3153_s1, %s3153_s1, %s3154_s17  }
  0x25   :  { %s3155_s20 = smov [#allocation7]   ;;  %s3075_s24 = scalar_lea.hbm %s3755_s2, 8192 }
  0x26   :  { %s44_s21 = sshll.u32 %s3155_s20, 4  ;;  %p3076_p2 = scmp.ne.s32.totalorder %s3755_s2, %s3075_s24  ;;  %s45_s21 = int_to_ptr.vmem [resolvable:$true] %s44_s21 }
  0x27   :  { %p3079_p3 = scmp.lt.u32.totalorder %s3075_s24, %s3755_s2 }
  0x29   :  { %p3081_p4 = pnand %p3079_p3, %p3076_p2 }
  0x2b   :  { %3084 = shalt.err (!%p3081_p4)
}
  0x2c   :  { %s3085_s6 = scalar_lea.vmem %s45_s21, 8192  ;;  %p3090_p6 = scmp.lt.s32.totalorder %s45_s21, %s45_s21 }
  0x2d   :  { %p3086_p5 = scmp.ne.s32.totalorder %s45_s21, %s3085_s6  ;;  %p3091_p7 = scmp.lt.s32.totalorder %s3085_s6, %s3085_s6 }
  0x2f   :  { %p3092_p8 = por %p3091_p7, %p3090_p6 }
  0x31   :  { %p3093_p9 = pnand %p3092_p8, %p3086_p5 }
  0x33   :  { %3096 = shalt.err (!%p3093_p9)
}
  0x34   :  { %50 = dma.hbm_to_vmem [thread:$0]  %s3755_s2, 8192, %s45_s21, [#allocation6], %s3150_s28, %s3150_s28, %s3151_s29  }
  0x35   :  { %3141 = dma.done.wait [#allocation3], 256  }
  0x36   :  { %3142 = vsyncadd [#allocation3], 4294967040 }
  0x37   :  { %3143 = dma.done.wait [#allocation6], 9216  }
  0x38   :  { %3144 = vsyncadd [#allocation6], 4294958080  ;;  %v3156_v0 = vmov 0.0   ;;  %v63_v1 = vld [vmem:[#allocation5 + $0x8] sm:$0xff]  ;;  %v65_v3 = vld [vmem:[#allocation5 + $0x18] sm:$0xff]  ;;  %vm158_vm0 = vcmask 130048  }
  0x39   :  { %229 = vmatprep.mubr.f32.mxu0 %v3156_v0  ;;  %306 = vmatprep.mubr.f32.mxu1 %v3156_v0  ;;  %v67_v2 = vld [vmem:[#allocation5 + $0x28] sm:$0xff]  ;;  %v69_v5 = vld [vmem:[#allocation5 + $0x38] sm:$0xff]  ;;  %v62_v6 = vld [vmem:[#allocation5] sm:$0xff]  ;;  %vm538_vm1 = vcmask 1041409   ;;  %s3158_s8 = smov [#allocation9]  }
  0x3a   :  { %v2245_v4 = vpack.c.bf16 %v67_v2, %v63_v1  ;;  %v66_v7 = vld [vmem:[#allocation5 + $0x20] sm:$0xff]  ;;  %v2249_v8 = vpack.c.bf16 %v69_v5, %v65_v3  ;;  %v64_v10 = vld [vmem:[#allocation5 + $0x10] sm:$0xff]  ;;  %v71_v14 = vld [vmem:[#allocation7 + $0x8] sm:$0xff]  ;;  %s2179_s9 = sshll.u32 %s3158_s8, 4  ;;  %s2180_s9 = int_to_ptr.vmem [resolvable:$true] %s2179_s9 }
  0x3b   :  { %v2247_v9 = vpack.c.bf16 %v66_v7, %v62_v6  ;;  %v68_v11 = vld [vmem:[#allocation5 + $0x30] sm:$0xff]  ;;  %v75_v15 = vld [vmem:[#allocation7 + $0x28] sm:$0xff]  ;;  %v73_v16 = vld [vmem:[#allocation7 + $0x18] sm:$0xff] }
  0x3c   :  { %v135_v12 = vld [vmem:[#allocation2] sm:$0xff]  ;;  %2246 = vmatprep.subr.bf16.mxu0 %v2245_v4  ;;  %v2251_v13 = vpack.c.bf16 %v68_v11, %v64_v10  ;;  %2250 = vmatprep.subr.bf16.mxu1 %v2249_v8  ;;  %v3236_v17 = vpack.c.bf16 %v75_v15, %v71_v14  ;;  %v77_v18 = vld [vmem:[#allocation7 + $0x38] sm:$0xff]  ;;  %v70_v19 = vld [vmem:[#allocation7] sm:$0xff] }
  0x3d   :  { %2248 = vmatpush1.bf16.msra.mxu0 %v2247_v9  ;;  %v74_v20 = vld [vmem:[#allocation7 + $0x20] sm:$0xff]  ;;  %v3238_v21 = vpack.c.bf16 %v77_v18, %v73_v16  ;;  %v72_v23 = vld [vmem:[#allocation7 + $0x10] sm:$0xff]  ;;  %v79_v25 = vld [vmem:[#allocation7 + $0x48] sm:$0xff] }
  0x3e   :  { %2252 = vmatpush1.bf16.msra.mxu1 %v2251_v13  ;;  %v3240_v22 = vpack.c.bf16 %v74_v20, %v70_v19  ;;  %v76_v24 = vld [vmem:[#allocation7 + $0x30] sm:$0xff]  ;;  %2254 = vmatprep.subr.bf16.mxu0 %v3236_v17  ;;  %v83_v27 = vld [vmem:[#allocation7 + $0x68] sm:$0xff]  ;;  %v81_v28 = vld [vmem:[#allocation7 + $0x58] sm:$0xff] }
  0x3f   :  { %v3243_v26 = vpack.c.bf16 %v76_v24, %v72_v23  ;;  %v85_v29 = vld [vmem:[#allocation7 + $0x78] sm:$0xff]  ;;  %2286 = vmatprep.subr.bf16.mxu1 %v3238_v21  ;;  %v3247_v30 = vpack.c.bf16 %v83_v27, %v79_v25  ;;  %v78_v32 = vld [vmem:[#allocation7 + $0x40] sm:$0xff]  ;;  %v80_v34 = vld [vmem:[#allocation7 + $0x50] sm:$0xff] }
  0x40   :  { %2193 = vmatmul.mubr.msk.f32.vlgmr.msra.gmra.mrb[0].mxu0 %vm158_vm0, %v135_v12  ;;  %v3249_v31 = vpack.c.bf16 %v85_v29, %v81_v28  ;;  %v82_v33 = vld [vmem:[#allocation7 + $0x60] sm:$0xff]  ;;  %v84_v36 = vld [vmem:[#allocation7 + $0x70] sm:$0xff]  ;;  %v87_v37 = vld [vmem:[#allocation7 + $0x88] sm:$0xff] }
  0x41   :  { %2195 = vmatmul.mubr.msk.f32.vlgmr.msra.gmra.mrb[0].mxu1 %vm158_vm0, %v135_v12  ;;  %2256 = vmatpush1.bf16.msra.mxu0 %v3240_v22  ;;  %v3253_v35 = vpack.c.bf16 %v82_v33, %v78_v32  ;;  %v91_v38 = vld [vmem:[#allocation7 + $0xa8] sm:$0xff]  ;;  %v3257_v39 = vpack.c.bf16 %v84_v36, %v80_v34  ;;  %v89_v41 = vld [vmem:[#allocation7 + $0x98] sm:$0xff]  ;;  %v86_v43 = vld [vmem:[#allocation7 + $0x80] sm:$0xff] }
  0x42   :  { %2288 = vmatpush1.bf16.msra.mxu1 %v3243_v26  ;;  %2258 = vmatprep.subr.bf16.mxu0 %v3247_v30  ;;  %v3259_v40 = vpack.c.bf16 %v91_v38, %v87_v37  ;;  %v93_v42 = vld [vmem:[#allocation7 + $0xb8] sm:$0xff]  ;;  %v90_v45 = vld [vmem:[#allocation7 + $0xa0] sm:$0xff]  ;;  %v88_v46 = vld [vmem:[#allocation7 + $0x90] sm:$0xff] }
  0x43   :  { %2290 = vmatprep.subr.bf16.mxu1 %v3249_v31  ;;  %v3262_v44 = vpack.c.bf16 %v93_v42, %v89_v41  ;;  %v92_v47 = vld [vmem:[#allocation7 + $0xb0] sm:$0xff]  ;;  %235 = vmatprep.mubr.f32.mxu0 %v3156_v0  ;;  %v95_v48 = vld [vmem:[#allocation7 + $0xc8] sm:$0xff]  ;;  %v97_v50 = vld [vmem:[#allocation7 + $0xd8] sm:$0xff]  ;;  %v3267_v51 = vpack.c.bf16 %v90_v45, %v86_v43 }
  0x44   :  { %v99_v49 = vld [vmem:[#allocation7 + $0xe8] sm:$0xff]  ;;  %312 = vmatprep.mubr.f32.mxu1 %v3156_v0  ;;  %v101_v52 = vld [vmem:[#allocation7 + $0xf8] sm:$0xff]  ;;  %v3271_v53 = vpack.c.bf16 %v92_v47, %v88_v46  ;;  %v94_v55 = vld [vmem:[#allocation7 + $0xc0] sm:$0xff] }
  0x45   :  { %2260 = vmatpush1.bf16.msra.mxu0 %v3253_v35  ;;  %v3273_v54 = vpack.c.bf16 %v99_v49, %v95_v48  ;;  %v98_v56 = vld [vmem:[#allocation7 + $0xe0] sm:$0xff]  ;;  %v96_v57 = vld [vmem:[#allocation7 + $0xd0] sm:$0xff]  ;;  %v3276_v58 = vpack.c.bf16 %v101_v52, %v97_v50  ;;  %v103_v60 = vld [vmem:[#allocation7 + $0x108] sm:$0xff] }
  0x46   :  { %2292 = vmatpush1.bf16.msra.mxu1 %v3257_v39  ;;  %2262 = vmatprep.subr.bf16.mxu0 %v3259_v40  ;;  %v100_v59 = vld [vmem:[#allocation7 + $0xf0] sm:$0xff]  ;;  %v107_v61 = vld [vmem:[#allocation7 + $0x128] sm:$0xff]  ;;  %v105_v62 = vld [vmem:[#allocation7 + $0x118] sm:$0xff]  ;;  %v3279_v1 = vpack.c.bf16 %v98_v56, %v94_v55 }
  0x47   :  { %2294 = vmatprep.subr.bf16.mxu1 %v3262_v44  ;;  %v109_v63 = vld [vmem:[#allocation7 + $0x138] sm:$0xff]  ;;  %v3283_v2 = vpack.c.bf16 %v100_v59, %v96_v57  ;;  %v3285_v3 = vpack.c.bf16 %v107_v61, %v103_v60  ;;  %v102_v4 = vld [vmem:[#allocation7 + $0x100] sm:$0xff]  ;;  %v104_v6 = vld [vmem:[#allocation7 + $0x110] sm:$0xff] }
  0x48   :  { %v106_v5 = vld [vmem:[#allocation7 + $0x120] sm:$0xff]  ;;  %v3288_v7 = vpack.c.bf16 %v109_v63, %v105_v62  ;;  %v108_v8 = vld [vmem:[#allocation7 + $0x130] sm:$0xff]  ;;  %v111_v9 = vld [vmem:[#allocation7 + $0x148] sm:$0xff] }
  0x49   :  { %2264 = vmatpush1.bf16.msra.mxu0 %v3267_v51  ;;  %v115_v10 = vld [vmem:[#allocation7 + $0x168] sm:$0xff]  ;;  %v113_v11 = vld [vmem:[#allocation7 + $0x158] sm:$0xff]  ;;  %v3291_v13 = vpack.c.bf16 %v106_v5, %v102_v4  ;;  %v110_v14 = vld [vmem:[#allocation7 + $0x140] sm:$0xff]  ;;  %v3295_v15 = vpack.c.bf16 %v108_v8, %v104_v6  ;;  %v138_v6 = vlaneseq }
  0x4a   :  { %2296 = vmatpush1.bf16.msra.mxu1 %v3271_v53  ;;  %2266 = vmatprep.subr.bf16.mxu0 %v3273_v54  ;;  %v117_v12 = vld [vmem:[#allocation7 + $0x178] sm:$0xff]  ;;  %v3297_v16 = vpack.c.bf16 %v115_v10, %v111_v9  ;;  %v114_v18 = vld [vmem:[#allocation7 + $0x160] sm:$0xff]  ;;  %v112_v19 = vld [vmem:[#allocation7 + $0x150] sm:$0xff] }
  0x4b   :  { %2298 = vmatprep.subr.bf16.mxu1 %v3276_v58  ;;  %v136_v20 = vld [vmem:[#allocation2 + $0x8] sm:$0xff]  ;;  %v3300_v23 = vpack.c.bf16 %v117_v12, %v113_v11  ;;  %v116_v24 = vld [vmem:[#allocation7 + $0x170] sm:$0xff]  ;;  %v119_v25 = vld [vmem:[#allocation7 + $0x188] sm:$0xff]  ;;  %v3306_v32 = vpack.c.bf16 %v114_v18, %v110_v14  ;;  %v139_v12 = vshrl.u32 %v138_v6, 7 }
  0x4c   :  { %v123_v27 = vld [vmem:[#allocation7 + $0x1a8] sm:$0xff]  ;;  %2194 = vmatmul.mubr.msk.f32.gmra.mrb[2].mxu0 %vm158_vm0, %v136_v20  ;;  %v121_v28 = vld [vmem:[#allocation7 + $0x198] sm:$0xff]  ;;  %2196 = vmatmul.mubr.msk.f32.gmra.mrb[2].mxu1 %vm158_vm0, %v136_v20  ;;  %v3311_v33 = vpack.c.bf16 %v116_v24, %v112_v19  ;;  %v118_v36 = vld [vmem:[#allocation7 + $0x180] sm:$0xff] }
  0x4d   :  { %2268 = vmatpush1.bf16.msra.mxu0 %v3279_v1  ;;  %v125_v29 = vld [vmem:[#allocation7 + $0x1b8] sm:$0xff]  ;;  %383 = vmatprep.mubr.f32.mxu0 %v3156_v0  ;;  %v3313_v34 = vpack.c.bf16 %v123_v27, %v119_v25  ;;  %v122_v37 = vld [vmem:[#allocation7 + $0x1a0] sm:$0xff]  ;;  %v120_v38 = vld [vmem:[#allocation7 + $0x190] sm:$0xff]  ;;  %v140_v14 = vsub.s32 0, %v139_v12  ;;  %v144_v19 = vsub.s32 1, %v139_v12  ;;  %v152_v25 = vsub.s32 3, %v139_v12 }
  0x4e   :  { %2300 = vmatpush1.bf16.msra.mxu1 %v3283_v2  ;;  %2270 = vmatprep.subr.bf16.mxu0 %v3285_v3  ;;  %v3316_v41 = vpack.c.bf16 %v125_v29, %v121_v28  ;;  %v124_v42 = vld [vmem:[#allocation7 + $0x1b0] sm:$0xff]  ;;  %v127_v43 = vld [vmem:[#allocation7 + $0x1c8] sm:$0xff]  ;;  %v129_v46 = vld [vmem:[#allocation7 + $0x1d8] sm:$0xff]  ;;  %v3319_v48 = vpack.c.bf16 %v122_v37, %v118_v36  ;;  %v148_v29 = vsub.s32 2, %v139_v12 }
  0x4f   :  { %2302 = vmatprep.subr.bf16.mxu1 %v3288_v7  ;;  %454 = vmatprep.mubr.f32.mxu1 %v3156_v0  ;;  %v131_v45 = vld [vmem:[#allocation7 + $0x1e8] sm:$0xff]  ;;  %v133_v47 = vld [vmem:[#allocation7 + $0x1f8] sm:$0xff]  ;;  %v3323_v49 = vpack.c.bf16 %v124_v42, %v120_v38  ;;  %v126_v52 = vld [vmem:[#allocation7 + $0x1c0] sm:$0xff] }
  0x50   :  { %v3325_v50 = vpack.c.bf16 %v131_v45, %v127_v43  ;;  %v130_v55 = vld [vmem:[#allocation7 + $0x1e0] sm:$0xff]  ;;  %v3328_v56 = vpack.c.bf16 %v133_v47, %v129_v46  ;;  %v128_v57 = vld [vmem:[#allocation7 + $0x1d0] sm:$0xff] }
  0x51   :  { %2272 = vmatpush1.bf16.msra.mxu0 %v3291_v13  ;;  %v132_v59 = vld [vmem:[#allocation7 + $0x1f0] sm:$0xff]  ;;  %v3331_v60 = vpack.c.bf16 %v130_v55, %v126_v52 }
  0x52   :  { %2304 = vmatpush1.bf16.msra.mxu1 %v3295_v15  ;;  %2274 = vmatprep.subr.bf16.mxu0 %v3297_v16  ;;  %v3335_v61 = vpack.c.bf16 %v132_v59, %v128_v57  ;;  %v134_v18 = vld [vmem:[%s3756_s3] sm:$0xf]  ;;  %s3157_s3 = smov [#allocation8]  }
  0x53   :  { %2306 = vmatprep.subr.bf16.mxu1 %v3300_v23  ;;  %v141_v20 = vrot.slane %v134_v18, %v140_v14  ;;  %v145_v24 = vrot.slane %v134_v18, %v144_v19  ;;  %v153_v46 = vrot.slane %v134_v18, %v152_v25  ;;  %s2166_s29 = sshll.u32 %s3157_s3, 4  ;;  %s2167_s29 = int_to_ptr.vmem [resolvable:$true] %s2166_s29 }
  0x54   :  { %s3097_s10 = scalar_lea.vmem %s2167_s29, 256  ;;  %p3102_p11 = scmp.lt.s32.totalorder %s2167_s29, %s2167_s29 }
  0x55   :  { %2276 = vmatpush1.bf16.msra.mxu0 %v3306_v32  ;;  %p3098_p10 = scmp.ne.s32.totalorder %s2167_s29, %s3097_s10  ;;  %p3103_p12 = scmp.lt.s32.totalorder %s3097_s10, %s3097_s10 }
  0x56   :  { %2308 = vmatpush1.bf16.msra.mxu1 %v3311_v33  ;;  %2278 = vmatprep.subr.bf16.mxu0 %v3313_v34 }
  0x57   :  { %2310 = vmatprep.subr.bf16.mxu1 %v3316_v41  ;;  %p3104_p13 = por %p3103_p12, %p3102_p11 }
  0x59   :  { %2280 = vmatpush1.bf16.msra.mxu0 %v3319_v48  ;;  %p3105_p0 = pnand %p3104_p13, %p3098_p10 }
  0x5a   :  { %2312 = vmatpush1.bf16.msra.mxu1 %v3323_v49  ;;  %2282 = vmatprep.subr.bf16.mxu0 %v3325_v50 }
  0x5b   :  { %2314 = vmatprep.subr.bf16.mxu1 %v3328_v56 }
  0x5d   :  { %2284 = vmatpush1.bf16.msra.mxu0 %v3331_v60 }
  0x5e   :  { %2316 = vmatpush1.bf16.msra.mxu1 %v3335_v61  ;;  %2318 = vmatprep.subr.bf16.mxu0 %v3236_v17 }
  0x5f   :  { %2350 = vmatprep.subr.bf16.mxu1 %v3238_v21 }
  0x60   :  { %384 = vmatmul.mubr.f32.vlgmr.msra.gmra.mrb[4].mxu0 %v3156_v0 }
  0x61   :  { %455 = vmatmul.mubr.f32.vlgmr.msra.gmra.mrb[4].mxu1 %v3156_v0  ;;  %2320 = vmatpush1.bf16.msra.mxu0 %v3240_v22 }
  0x62   :  { %2352 = vmatpush1.bf16.msra.mxu1 %v3243_v26  ;;  %2322 = vmatprep.subr.bf16.mxu0 %v3247_v30 }
  0x63   :  { %2354 = vmatprep.subr.bf16.mxu1 %v3249_v31  ;;  %605 = vmatprep.mubr.f32.mxu0 %v3156_v0 }
  0x64   :  { %676 = vmatprep.mubr.f32.mxu1 %v3156_v0 }
  0x65   :  { %2324 = vmatpush1.bf16.msra.mxu0 %v3253_v35 }
  0x66   :  { %2356 = vmatpush1.bf16.msra.mxu1 %v3257_v39  ;;  %2326 = vmatprep.subr.bf16.mxu0 %v3259_v40 }
  0x67   :  { %2358 = vmatprep.subr.bf16.mxu1 %v3262_v44 }
  0x69   :  { %2328 = vmatpush1.bf16.msra.mxu0 %v3267_v51 }
  0x6a   :  { %2360 = vmatpush1.bf16.msra.mxu1 %v3271_v53  ;;  %2330 = vmatprep.subr.bf16.mxu0 %v3273_v54 }
  0x6b   :  { %2362 = vmatprep.subr.bf16.mxu1 %v3276_v58 }
  0x6d   :  { %2332 = vmatpush1.bf16.msra.mxu0 %v3279_v1 }
  0x6e   :  { %2364 = vmatpush1.bf16.msra.mxu1 %v3283_v2  ;;  %2334 = vmatprep.subr.bf16.mxu0 %v3285_v3 }
  0x6f   :  { %2366 = vmatprep.subr.bf16.mxu1 %v3288_v7 }
  0x71   :  { %2336 = vmatpush1.bf16.msra.mxu0 %v3291_v13 }
  0x72   :  { %2368 = vmatpush1.bf16.msra.mxu1 %v3295_v15  ;;  %2338 = vmatprep.subr.bf16.mxu0 %v3297_v16 }
  0x73   :  { %2370 = vmatprep.subr.bf16.mxu1 %v3300_v23 }
  0x75   :  { %2340 = vmatpush1.bf16.msra.mxu0 %v3306_v32 }
  0x76   :  { %2372 = vmatpush1.bf16.msra.mxu1 %v3311_v33  ;;  %2342 = vmatprep.subr.bf16.mxu0 %v3313_v34 }
  0x77   :  { %2374 = vmatprep.subr.bf16.mxu1 %v3316_v41 }
  0x79   :  { %2344 = vmatpush1.bf16.msra.mxu0 %v3319_v48 }
  0x7a   :  { %2376 = vmatpush1.bf16.msra.mxu1 %v3323_v49  ;;  %2346 = vmatprep.subr.bf16.mxu0 %v3325_v50 }
  0x7b   :  { %2378 = vmatprep.subr.bf16.mxu1 %v3328_v56 }
  0x7d   :  { %2348 = vmatpush1.bf16.msra.mxu0 %v3331_v60 }
  0x7e   :  { %2380 = vmatpush1.bf16.msra.mxu1 %v3335_v61  ;;  %2382 = vmatprep.subr.bf16.mxu0 %v3236_v17 }
  0x7f   :  { %2414 = vmatprep.subr.bf16.mxu1 %v3238_v21 }
 0x113   :  { %v231_v62 = vpop.f32.mrb[0].mxu0 }
 0x114   :  { %v233_v63 = vpop.f32.mrb[1].mxu0  ;;  %v308_v4 = vpop.f32.mrb[0].mxu1  ;;  %v3381_v27 = vadd.f32 %v231_v62, %v141_v20 }
 0x115   :  { %v310_v5 = vpop.f32.mrb[1].mxu1  ;;  %v3383_v28 = vadd.f32 %v233_v63, %v145_v24  ;;  %v149_v63 = vrot.slane %v134_v18, %v148_v29 }
 0x117   :  { %v3398_v25 = vadd.f32 %v308_v4, %v149_v63 }
 0x11f   :  { %v237_v8 = vpop.f32.mrb[2].mxu0  ;;  %v314_v10 = vpop.f32.mrb[2].mxu1 }
 0x120   :  { %v239_v9 = vpop.f32.mrb[3].mxu0  ;;  %v316_v11 = vpop.f32.mrb[3].mxu1  ;;  %v3385_v37 = vadd.f32 %v237_v8, %v141_v20  ;;  %v3395_v20 = vadd.f32 %v310_v5, %v153_v46  ;;  %v3401_v29 = vadd.f32 %v314_v10, %v149_v63 }
 0x121   :  { %v3388_v47 = vadd.f32 %v239_v9, %v145_v24  ;;  %v3393_v12 = vadd.f32 %v316_v11, %v153_v46 }
 0x133   :  { %v385_v36 = vpop.f32.mrb[4].mxu0 }
 0x134   :  { %v465_v38 = vrot.slane %v385_v36, 1  ;;  %v477_v42 = vadd.f32 %v385_v36, %v3381_v27  ;;  %v456_v43 = vpop.f32.mrb[4].mxu1  ;;  %v387_v45 = vpop.f32.mrb[5].mxu0 }
 0x135   :  { %v466_v52 = vrot.slane %v387_v45, 1  ;;  %v478_v55 = vadd.f32 %v387_v45, %v3383_v28  ;;  %v458_v57 = vpop.f32.mrb[5].mxu1  ;;  %v467_v36 = vrot.slane %v456_v43, 1  ;;  %v479_v11 = vadd.f32 %v456_v43, %v3398_v25 }
 0x136   :  { %v481_v59 = vadd.f32 %v465_v38, %v3385_v37  ;;  %v2197_v62 = vmul.f32 -1.442695, %v477_v42  ;;  %v468_v19 = vrot.slane %v458_v57, 1  ;;  %v480_v24 = vadd.f32 %v458_v57, %v3395_v20 }
 0x137   :  { %v482_v6 = vadd.f32 %v466_v52, %v3388_v47  ;;  %v2199_v8 = vmul.f32 -1.442695, %v478_v55  ;;  %v483_v5 = vadd.f32 %v467_v36, %v3401_v29 }
 0x138   :  { %2775 = vpow2.f32 %v2197_v62  ;;  %v2198_v14 = vmul.f32 -1.442695, %v481_v59  ;;  %v484_v18 = vadd.f32 %v468_v19, %v3393_v12  ;;  %v2201_v38 = vmul.f32 -1.442695, %v480_v24 }
 0x139   :  { %v2200_v9 = vmul.f32 -1.442695, %v482_v6 }
 0x13a   :  { %2777 = vpow2.f32 %v2198_v14  ;;  %v2202_v42 = vmul.f32 -1.442695, %v484_v18 }
 0x13b   :  { %2779 = vpow2.f32 %v2199_v8 }
 0x13c   :  { %2781 = vpow2.f32 %v2200_v9 }
 0x13d   :  { %2783 = vtanh.f32 %v479_v11 }
 0x13e   :  { %2785 = vpow2.f32 %v2201_v38 }
 0x13f   :  { %2787 = vpow2.f32 %v2202_v42 }
 0x142   :  { %v2776_v45 = vpop.eup %2775 }
 0x143   :  { %v491_v46 = vadd.f32 1.0, %v2776_v45 }
 0x144   :  { %v2778_v52 = vpop.eup %2777 }
 0x145   :  { %v2780_v4 = vpop.eup %2779  ;;  %v492_v55 = vadd.f32 1.0, %v2778_v52  ;;  %2789 = vrcp.f32 %v491_v46 }
 0x146   :  { %v2782_v57 = vpop.eup %2781  ;;  %2791 = vtanh.f32 %v483_v5  ;;  %v503_v10 = vadd.f32 1.0, %v2780_v4 }
 0x147   :  { %2793 = vrcp.f32 %v492_v55  ;;  %v504_v59 = vadd.f32 1.0, %v2782_v57  ;;  %v2784_v43 = vpop.eup %2783 }
 0x148   :  { %2795 = vrcp.f32 %v503_v10  ;;  %v2786_v62 = vpop.eup %2785 }
 0x149   :  { %2797 = vrcp.f32 %v504_v59  ;;  %v2788_v63 = vpop.eup %2787  ;;  %v517_v9 = vadd.f32 1.0, %v2786_v62 }
 0x14a   :  { %v518_v36 = vadd.f32 1.0, %v2788_v63 }
 0x14b   :  { %2799 = vrcp.f32 %v517_v9 }
 0x14c   :  { %2801 = vrcp.f32 %v518_v36 }
 0x14f   :  { %v2790_v6 = vpop.eup %2789 }
 0x150   :  { %v2792_v8 = vpop.eup %2791  ;;  %v525_v14 = vmul.f32 %v2790_v6, %v2784_v43 }
 0x151   :  { %v2794_v19 = vpop.eup %2793 }
 0x152   :  { %v2796_v24 = vpop.eup %2795  ;;  %v526_v18 = vmul.f32 %v2794_v19, %v2792_v8 }
 0x153   :  { %v2798_v11 = vpop.eup %2797  ;;  %v523_v38 = vmul.f32 0.0, %v2796_v24 }
 0x154   :  { %v524_v42 = vmul.f32 0.0, %v2798_v11 }
 0x155   :  { %v3405_v45 = vadd.f32 %v525_v14, %v523_v38  ;;  %v2800_v46 = vpop.eup %2799 }
 0x156   :  { %v3407_v5 = vadd.f32 %v526_v18, %v524_v42  ;;  %v2802_v52 = vpop.eup %2801 }
 0x157   :  { %2803 = vtanh.f32 %v3405_v45 }
 0x158   :  { %2805 = vtanh.f32 %v3407_v5 }
 0x161   :  { %v2804_v4 = vpop.eup %2803 }
 0x162   :  { %v2806_v55 = vpop.eup %2805  ;;  %v531_v57 = vmul.f32 %v2804_v4, %v2800_v46 }
 0x163   :  { %v532_v10 = vmul.f32 %v2806_v55, %v2802_v52 }
 0x164   :  { %533 = vst [vmem:[#allocation8] sm:$0x1] %v531_v57 }
 0x165   :  { %534 = vst [vmem:[#allocation8 + $0x8] sm:$0x1] %v532_v10  ;;  %v537_v59 = vrot.slane %v532_v10, 7 }
 0x167   :  { %v539_v43 = vsel %vm538_vm1, %v537_v59, %v531_v57 }
 0x168   :  { %606 = vmatmul.mubr.f32.vlgmr.msra.gmra.mrb[6].mxu0 %v539_v43  ;;  %677 = vmatmul.mubr.f32.vlgmr.msra.gmra.mrb[6].mxu1 %v539_v43 }
 0x169   :  { %2384 = vmatpush1.bf16.msra.mxu0 %v3240_v22  ;;  %2416 = vmatpush1.bf16.msra.mxu1 %v3243_v26 }
 0x16a   :  { %2386 = vmatprep.subr.bf16.mxu0 %v3247_v30  ;;  %2418 = vmatprep.subr.bf16.mxu1 %v3249_v31 }
 0x16b   :  { %832 = vmatprep.mubr.f32.mxu0 %v3156_v0  ;;  %903 = vmatprep.mubr.f32.mxu1 %v3156_v0 }
 0x16d   :  { %2388 = vmatpush1.bf16.msra.mxu0 %v3253_v35  ;;  %2420 = vmatpush1.bf16.msra.mxu1 %v3257_v39 }
 0x16e   :  { %2390 = vmatprep.subr.bf16.mxu0 %v3259_v40  ;;  %2422 = vmatprep.subr.bf16.mxu1 %v3262_v44 }
 0x171   :  { %2392 = vmatpush1.bf16.msra.mxu0 %v3267_v51  ;;  %2424 = vmatpush1.bf16.msra.mxu1 %v3271_v53 }
 0x172   :  { %2394 = vmatprep.subr.bf16.mxu0 %v3273_v54  ;;  %2426 = vmatprep.subr.bf16.mxu1 %v3276_v58 }
 0x175   :  { %2396 = vmatpush1.bf16.msra.mxu0 %v3279_v1  ;;  %2428 = vmatpush1.bf16.msra.mxu1 %v3283_v2 }
 0x176   :  { %2398 = vmatprep.subr.bf16.mxu0 %v3285_v3  ;;  %2430 = vmatprep.subr.bf16.mxu1 %v3288_v7 }
 0x179   :  { %2400 = vmatpush1.bf16.msra.mxu0 %v3291_v13  ;;  %2432 = vmatpush1.bf16.msra.mxu1 %v3295_v15 }
 0x17a   :  { %2402 = vmatprep.subr.bf16.mxu0 %v3297_v16  ;;  %2434 = vmatprep.subr.bf16.mxu1 %v3300_v23 }
 0x17d   :  { %2404 = vmatpush1.bf16.msra.mxu0 %v3306_v32  ;;  %2436 = vmatpush1.bf16.msra.mxu1 %v3311_v33 }
 0x17e   :  { %2406 = vmatprep.subr.bf16.mxu0 %v3313_v34  ;;  %2438 = vmatprep.subr.bf16.mxu1 %v3316_v41 }
 0x181   :  { %2408 = vmatpush1.bf16.msra.mxu0 %v3319_v48  ;;  %2440 = vmatpush1.bf16.msra.mxu1 %v3323_v49 }
 0x182   :  { %2410 = vmatprep.subr.bf16.mxu0 %v3325_v50  ;;  %2442 = vmatprep.subr.bf16.mxu1 %v3328_v56 }
 0x185   :  { %2412 = vmatpush1.bf16.msra.mxu0 %v3331_v60  ;;  %2444 = vmatpush1.bf16.msra.mxu1 %v3335_v61 }
 0x186   :  { %2446 = vmatprep.subr.bf16.mxu0 %v3236_v17  ;;  %2478 = vmatprep.subr.bf16.mxu1 %v3238_v21 }
 0x23b   :  { %v607_v62 = vpop.f32.mrb[6].mxu0  ;;  %v678_v63 = vpop.f32.mrb[6].mxu1 }
 0x23c   :  { %v687_v6 = vrot.slane %v607_v62, 7  ;;  %v703_v8 = vadd.f32 %v607_v62, %v3385_v37  ;;  %v609_v14 = vpop.f32.mrb[7].mxu0  ;;  %v680_v19 = vpop.f32.mrb[7].mxu1  ;;  %v689_v57 = vrot.slane %v678_v63, 7  ;;  %v705_v10 = vadd.f32 %v678_v63, %v3401_v29 }
 0x23d   :  { %v688_v9 = vrot.slane %v609_v14, 7  ;;  %v704_v24 = vadd.f32 %v609_v14, %v3388_v47  ;;  %v690_v38 = vrot.slane %v680_v19, 7  ;;  %v706_v55 = vadd.f32 %v680_v19, %v3393_v12 }
 0x23e   :  { %v699_v18 = vadd.f32 %v687_v6, %v3381_v27  ;;  %v2204_v36 = vmul.f32 -1.442695, %v703_v8  ;;  %v701_v6 = vadd.f32 %v689_v57, %v3398_v25 }
 0x23f   :  { %v700_v11 = vadd.f32 %v688_v9, %v3383_v28  ;;  %v2206_v46 = vmul.f32 -1.442695, %v704_v24  ;;  %v702_v4 = vadd.f32 %v690_v38, %v3395_v20  ;;  %v2208_v43 = vmul.f32 -1.442695, %v706_v55 }
 0x240   :  { %v2203_v42 = vmul.f32 -1.442695, %v699_v18  ;;  %2807 = vpow2.f32 %v2204_v36  ;;  %v747_v55 = vrot.slane %v3405_v45, 7 }
 0x241   :  { %v2205_v52 = vmul.f32 -1.442695, %v700_v11  ;;  %v2207_v59 = vmul.f32 -1.442695, %v702_v4 }
 0x242   :  { %2809 = vpow2.f32 %v2203_v42 }
 0x243   :  { %2811 = vpow2.f32 %v2205_v52 }
 0x244   :  { %2813 = vpow2.f32 %v2206_v46 }
 0x245   :  { %2815 = vtanh.f32 %v705_v10 }
 0x246   :  { %2817 = vpow2.f32 %v2207_v59  ;;  %v748_v59 = vrot.slane %v3407_v5, 7 }
 0x247   :  { %2819 = vpow2.f32 %v2208_v43 }
 0x24a   :  { %v2808_v62 = vpop.eup %2807 }
 0x24b   :  { %v714_v8 = vadd.f32 1.0, %v2808_v62 }
 0x24c   :  { %v2810_v14 = vpop.eup %2809 }
 0x24d   :  { %v2812_v9 = vpop.eup %2811  ;;  %v713_v24 = vadd.f32 1.0, %v2810_v14  ;;  %2821 = vrcp.f32 %v714_v8 }
 0x24e   :  { %v2814_v18 = vpop.eup %2813  ;;  %2823 = vtanh.f32 %v701_v6  ;;  %v725_v36 = vadd.f32 1.0, %v2812_v9 }
 0x24f   :  { %2825 = vrcp.f32 %v713_v24  ;;  %v726_v19 = vadd.f32 1.0, %v2814_v18  ;;  %v2816_v63 = vpop.eup %2815 }
 0x250   :  { %2827 = vrcp.f32 %v725_v36  ;;  %v2818_v11 = vpop.eup %2817 }
 0x251   :  { %2829 = vrcp.f32 %v726_v19  ;;  %v2820_v38 = vpop.eup %2819  ;;  %v739_v57 = vadd.f32 1.0, %v2818_v11 }
 0x252   :  { %v740_v62 = vadd.f32 1.0, %v2820_v38 }
 0x253   :  { %2831 = vrcp.f32 %v739_v57 }
 0x254   :  { %2833 = vrcp.f32 %v740_v62 }
 0x257   :  { %v2822_v42 = vpop.eup %2821 }
 0x258   :  { %v2824_v46 = vpop.eup %2823  ;;  %v754_v52 = vmul.f32 %v2822_v42, %v2816_v63 }
 0x259   :  { %v2826_v4 = vpop.eup %2825 }
 0x25a   :  { %v2828_v10 = vpop.eup %2827  ;;  %v753_v43 = vmul.f32 %v2826_v4, %v2824_v46 }
 0x25b   :  { %v2830_v6 = vpop.eup %2829  ;;  %v751_v8 = vmul.f32 %v2828_v10, %v747_v55 }
 0x25c   :  { %v752_v14 = vmul.f32 %v2830_v6, %v748_v59 }
 0x25d   :  { %v3456_v9 = vadd.f32 %v753_v43, %v751_v8  ;;  %v2832_v45 = vpop.eup %2831 }
 0x25e   :  { %v3458_v24 = vadd.f32 %v754_v52, %v752_v14  ;;  %v2834_v18 = vpop.eup %2833 }
 0x25f   :  { %2835 = vtanh.f32 %v3456_v9 }
 0x260   :  { %2837 = vtanh.f32 %v3458_v24 }
 0x269   :  { %v2836_v36 = vpop.eup %2835 }
 0x26a   :  { %v2838_v19 = vpop.eup %2837  ;;  %v759_v5 = vmul.f32 %v2836_v36, %v2832_v45 }
 0x26b   :  { %v760_v63 = vmul.f32 %v2838_v19, %v2834_v18 }
 0x26c   :  { %761 = vst [vmem:[#allocation8] sm:$0x2] %v759_v5  ;;  %v765_v11 = vrot.slane %v759_v5, 1 }
 0x26d   :  { %762 = vst [vmem:[#allocation8 + $0x8] sm:$0x2] %v760_v63 }
 0x26e   :  { %v766_v38 = vsel %vm538_vm1, %v760_v63, %v765_v11 }
 0x26f   :  { %833 = vmatmul.mubr.f32.vlgmr.msra.gmra.mrb[8].mxu0 %v766_v38  ;;  %904 = vmatmul.mubr.f32.vlgmr.msra.gmra.mrb[8].mxu1 %v766_v38 }
 0x270   :  { %2448 = vmatpush1.bf16.msra.mxu0 %v3240_v22  ;;  %2480 = vmatpush1.bf16.msra.mxu1 %v3243_v26 }
 0x271   :  { %2450 = vmatprep.subr.bf16.mxu0 %v3247_v30  ;;  %2482 = vmatprep.subr.bf16.mxu1 %v3249_v31 }
 0x272   :  { %1064 = vmatprep.mubr.f32.mxu0 %v3156_v0  ;;  %1135 = vmatprep.mubr.f32.mxu1 %v3156_v0 }
 0x274   :  { %2452 = vmatpush1.bf16.msra.mxu0 %v3253_v35  ;;  %2484 = vmatpush1.bf16.msra.mxu1 %v3257_v39 }
 0x275   :  { %2454 = vmatprep.subr.bf16.mxu0 %v3259_v40  ;;  %2486 = vmatprep.subr.bf16.mxu1 %v3262_v44 }
 0x278   :  { %2456 = vmatpush1.bf16.msra.mxu0 %v3267_v51  ;;  %2488 = vmatpush1.bf16.msra.mxu1 %v3271_v53 }
 0x279   :  { %2458 = vmatprep.subr.bf16.mxu0 %v3273_v54  ;;  %2490 = vmatprep.subr.bf16.mxu1 %v3276_v58 }
 0x27c   :  { %2460 = vmatpush1.bf16.msra.mxu0 %v3279_v1  ;;  %2492 = vmatpush1.bf16.msra.mxu1 %v3283_v2 }
 0x27d   :  { %2462 = vmatprep.subr.bf16.mxu0 %v3285_v3  ;;  %2494 = vmatprep.subr.bf16.mxu1 %v3288_v7 }
 0x280   :  { %2464 = vmatpush1.bf16.msra.mxu0 %v3291_v13  ;;  %2496 = vmatpush1.bf16.msra.mxu1 %v3295_v15 }
 0x281   :  { %2466 = vmatprep.subr.bf16.mxu0 %v3297_v16  ;;  %2498 = vmatprep.subr.bf16.mxu1 %v3300_v23 }
 0x284   :  { %2468 = vmatpush1.bf16.msra.mxu0 %v3306_v32  ;;  %2500 = vmatpush1.bf16.msra.mxu1 %v3311_v33 }
 0x285   :  { %2470 = vmatprep.subr.bf16.mxu0 %v3313_v34  ;;  %2502 = vmatprep.subr.bf16.mxu1 %v3316_v41 }
 0x288   :  { %2472 = vmatpush1.bf16.msra.mxu0 %v3319_v48  ;;  %2504 = vmatpush1.bf16.msra.mxu1 %v3323_v49 }
 0x289   :  { %2474 = vmatprep.subr.bf16.mxu0 %v3325_v50  ;;  %2506 = vmatprep.subr.bf16.mxu1 %v3328_v56 }
 0x28c   :  { %2476 = vmatpush1.bf16.msra.mxu0 %v3331_v60  ;;  %2508 = vmatpush1.bf16.msra.mxu1 %v3335_v61 }
 0x28d   :  { %2510 = vmatprep.subr.bf16.mxu0 %v3236_v17  ;;  %2542 = vmatprep.subr.bf16.mxu1 %v3238_v21 }
 0x342   :  { %v834_v42 = vpop.f32.mrb[8].mxu0  ;;  %v905_v46 = vpop.f32.mrb[8].mxu1 }
 0x343   :  { %v914_v52 = vrot.slane %v834_v42, 6  ;;  %v918_v4 = vrot.slane %v834_v42, 7  ;;  %v836_v55 = vpop.f32.mrb[9].mxu0  ;;  %v907_v57 = vpop.f32.mrb[9].mxu1  ;;  %v916_v63 = vrot.slane %v905_v46, 6  ;;  %v920_v11 = vrot.slane %v905_v46, 7 }
 0x344   :  { %v915_v10 = vrot.slane %v836_v55, 6  ;;  %v919_v59 = vrot.slane %v836_v55, 7  ;;  %v917_v19 = vrot.slane %v907_v57, 6  ;;  %v921_v5 = vrot.slane %v907_v57, 7 }
 0x345   :  { %v930_v43 = vadd.f32 %v914_v52, %v3381_v27  ;;  %v934_v62 = vadd.f32 %v918_v4, %v3385_v37  ;;  %v932_v52 = vadd.f32 %v916_v63, %v3398_v25  ;;  %v936_v4 = vadd.f32 %v920_v11, %v3401_v29 }
 0x346   :  { %v931_v6 = vadd.f32 %v915_v10, %v3383_v28  ;;  %v935_v8 = vadd.f32 %v919_v59, %v3388_v47  ;;  %v933_v38 = vadd.f32 %v917_v19, %v3395_v20  ;;  %v937_v42 = vadd.f32 %v921_v5, %v3393_v12 }
 0x347   :  { %v2209_v14 = vmul.f32 -1.442695, %v930_v43  ;;  %v2210_v45 = vmul.f32 -1.442695, %v934_v62 }
 0x348   :  { %v2211_v18 = vmul.f32 -1.442695, %v931_v6  ;;  %v2212_v36 = vmul.f32 -1.442695, %v935_v8  ;;  %v2213_v55 = vmul.f32 -1.442695, %v933_v38 }
 0x349   :  { %2839 = vpow2.f32 %v2209_v14  ;;  %v2214_v10 = vmul.f32 -1.442695, %v937_v42  ;;  %v978_v38 = vrot.slane %v3456_v9, 7 }
 0x34a   :  { %2841 = vpow2.f32 %v2210_v45 }
 0x34b   :  { %2843 = vpow2.f32 %v2211_v18 }
 0x34c   :  { %2845 = vpow2.f32 %v2212_v36 }
 0x34d   :  { %2847 = vtanh.f32 %v932_v52 }
 0x34e   :  { %2849 = vtanh.f32 %v936_v4 }
 0x34f   :  { %2851 = vpow2.f32 %v2213_v55  ;;  %v979_v55 = vrot.slane %v3458_v24, 7 }
 0x350   :  { %2853 = vpow2.f32 %v2214_v10 }
 0x353   :  { %v2840_v59 = vpop.eup %2839 }
 0x354   :  { %v2842_v43 = vpop.eup %2841  ;;  %v944_v57 = vadd.f32 1.0, %v2840_v59 }
 0x355   :  { %v2844_v62 = vpop.eup %2843  ;;  %v945_v46 = vadd.f32 1.0, %v2842_v43 }
 0x356   :  { %v2846_v6 = vpop.eup %2845  ;;  %2855 = vrcp.f32 %v944_v57  ;;  %v956_v8 = vadd.f32 1.0, %v2844_v62 }
 0x357   :  { %2857 = vrcp.f32 %v945_v46  ;;  %v957_v14 = vadd.f32 1.0, %v2846_v6  ;;  %v2848_v45 = vpop.eup %2847 }
 0x358   :  { %2859 = vrcp.f32 %v956_v8  ;;  %v2850_v18 = vpop.eup %2849 }
 0x359   :  { %2861 = vrcp.f32 %v957_v14  ;;  %v2852_v36 = vpop.eup %2851 }
 0x35a   :  { %v2854_v19 = vpop.eup %2853  ;;  %v970_v42 = vadd.f32 1.0, %v2852_v36 }
 0x35b   :  { %v971_v10 = vadd.f32 1.0, %v2854_v19 }
 0x35c   :  { %2863 = vrcp.f32 %v970_v42 }
 0x35d   :  { %2865 = vrcp.f32 %v971_v10 }
 0x360   :  { %v2856_v5 = vpop.eup %2855 }
 0x361   :  { %v2858_v63 = vpop.eup %2857  ;;  %v984_v11 = vmul.f32 %v2856_v5, %v2848_v45 }
 0x362   :  { %v2860_v52 = vpop.eup %2859  ;;  %v985_v4 = vmul.f32 %v2858_v63, %v2850_v18 }
 0x363   :  { %v2862_v59 = vpop.eup %2861  ;;  %v982_v43 = vmul.f32 %v2860_v52, %v978_v38 }
 0x364   :  { %v983_v57 = vmul.f32 %v2862_v59, %v979_v55 }
 0x365   :  { %v3507_v62 = vadd.f32 %v984_v11, %v982_v43 }
 0x366   :  { %v3509_v46 = vadd.f32 %v985_v4, %v983_v57  ;;  %v2864_v9 = vpop.eup %2863 }
 0x367   :  { %2867 = vtanh.f32 %v3507_v62  ;;  %v2866_v6 = vpop.eup %2865 }
 0x368   :  { %2869 = vtanh.f32 %v3509_v46 }
 0x371   :  { %v2868_v8 = vpop.eup %2867 }
 0x372   :  { %v2870_v14 = vpop.eup %2869  ;;  %v990_v45 = vmul.f32 %v2868_v8, %v2864_v9 }
 0x373   :  { %v991_v24 = vmul.f32 %v2870_v14, %v2866_v6 }
 0x374   :  { %992 = vst [vmem:[#allocation8] sm:$0x4] %v990_v45  ;;  %v996_v18 = vrot.slane %v990_v45, 2 }
 0x375   :  { %993 = vst [vmem:[#allocation8 + $0x8] sm:$0x4] %v991_v24  ;;  %v997_v36 = vrot.slane %v991_v24, 1 }
 0x377   :  { %v998_v19 = vsel %vm538_vm1, %v997_v36, %v996_v18 }
 0x378   :  { %1065 = vmatmul.mubr.f32.vlgmr.msra.gmra.mrb[10].mxu0 %v998_v19  ;;  %1136 = vmatmul.mubr.f32.vlgmr.msra.gmra.mrb[10].mxu1 %v998_v19 }
 0x379   :  { %2512 = vmatpush1.bf16.msra.mxu0 %v3240_v22  ;;  %2544 = vmatpush1.bf16.msra.mxu1 %v3243_v26 }
 0x37a   :  { %2514 = vmatprep.subr.bf16.mxu0 %v3247_v30  ;;  %2546 = vmatprep.subr.bf16.mxu1 %v3249_v31 }
 0x37b   :  { %1296 = vmatprep.mubr.f32.mxu0 %v3156_v0  ;;  %1367 = vmatprep.mubr.f32.mxu1 %v3156_v0 }
 0x37d   :  { %2516 = vmatpush1.bf16.msra.mxu0 %v3253_v35  ;;  %2548 = vmatpush1.bf16.msra.mxu1 %v3257_v39 }
 0x37e   :  { %2518 = vmatprep.subr.bf16.mxu0 %v3259_v40  ;;  %2550 = vmatprep.subr.bf16.mxu1 %v3262_v44 }
 0x381   :  { %2520 = vmatpush1.bf16.msra.mxu0 %v3267_v51  ;;  %2552 = vmatpush1.bf16.msra.mxu1 %v3271_v53 }
 0x382   :  { %2522 = vmatprep.subr.bf16.mxu0 %v3273_v54  ;;  %2554 = vmatprep.subr.bf16.mxu1 %v3276_v58 }
 0x385   :  { %2524 = vmatpush1.bf16.msra.mxu0 %v3279_v1  ;;  %2556 = vmatpush1.bf16.msra.mxu1 %v3283_v2 }
 0x386   :  { %2526 = vmatprep.subr.bf16.mxu0 %v3285_v3  ;;  %2558 = vmatprep.subr.bf16.mxu1 %v3288_v7 }
 0x389   :  { %2528 = vmatpush1.bf16.msra.mxu0 %v3291_v13  ;;  %2560 = vmatpush1.bf16.msra.mxu1 %v3295_v15 }
 0x38a   :  { %2530 = vmatprep.subr.bf16.mxu0 %v3297_v16  ;;  %2562 = vmatprep.subr.bf16.mxu1 %v3300_v23 }
 0x38d   :  { %2532 = vmatpush1.bf16.msra.mxu0 %v3306_v32  ;;  %2564 = vmatpush1.bf16.msra.mxu1 %v3311_v33 }
 0x38e   :  { %2534 = vmatprep.subr.bf16.mxu0 %v3313_v34  ;;  %2566 = vmatprep.subr.bf16.mxu1 %v3316_v41 }
 0x391   :  { %2536 = vmatpush1.bf16.msra.mxu0 %v3319_v48  ;;  %2568 = vmatpush1.bf16.msra.mxu1 %v3323_v49 }
 0x392   :  { %2538 = vmatprep.subr.bf16.mxu0 %v3325_v50  ;;  %2570 = vmatprep.subr.bf16.mxu1 %v3328_v56 }
 0x395   :  { %2540 = vmatpush1.bf16.msra.mxu0 %v3331_v60  ;;  %2572 = vmatpush1.bf16.msra.mxu1 %v3335_v61 }
 0x396   :  { %2574 = vmatprep.subr.bf16.mxu0 %v3236_v17  ;;  %2606 = vmatprep.subr.bf16.mxu1 %v3238_v21 }
 0x44b   :  { %v1066_v5 = vpop.f32.mrb[10].mxu0  ;;  %v1137_v63 = vpop.f32.mrb[10].mxu1 }
 0x44c   :  { %v1146_v11 = vrot.slane %v1066_v5, 5  ;;  %v1150_v38 = vrot.slane %v1066_v5, 6  ;;  %v1068_v42 = vpop.f32.mrb[11].mxu0  ;;  %v1139_v52 = vpop.f32.mrb[11].mxu1  ;;  %v1148_v18 = vrot.slane %v1137_v63, 5  ;;  %v1152_v36 = vrot.slane %v1137_v63, 6 }
 0x44d   :  { %v1147_v4 = vrot.slane %v1068_v42, 5  ;;  %v1151_v55 = vrot.slane %v1068_v42, 6  ;;  %v1149_v45 = vrot.slane %v1139_v52, 5  ;;  %v1153_v24 = vrot.slane %v1139_v52, 6 }
 0x44e   :  { %v1162_v10 = vadd.f32 %v1146_v11, %v3381_v27  ;;  %v1166_v59 = vadd.f32 %v1150_v38, %v3385_v37  ;;  %v1164_v11 = vadd.f32 %v1148_v18, %v3398_v25  ;;  %v1168_v38 = vadd.f32 %v1152_v36, %v3401_v29 }
 0x44f   :  { %v1163_v43 = vadd.f32 %v1147_v4, %v3383_v28  ;;  %v1167_v57 = vadd.f32 %v1151_v55, %v3388_v47  ;;  %v1165_v19 = vadd.f32 %v1149_v45, %v3395_v20  ;;  %v1169_v5 = vadd.f32 %v1153_v24, %v3393_v12 }
 0x450   :  { %v2215_v9 = vmul.f32 -1.442695, %v1162_v10  ;;  %v2216_v6 = vmul.f32 -1.442695, %v1166_v59 }
 0x451   :  { %v2217_v8 = vmul.f32 -1.442695, %v1163_v43  ;;  %v2218_v14 = vmul.f32 -1.442695, %v1167_v57  ;;  %v2219_v42 = vmul.f32 -1.442695, %v1165_v19 }
 0x452   :  { %2871 = vpow2.f32 %v2215_v9  ;;  %v2220_v4 = vmul.f32 -1.442695, %v1169_v5  ;;  %v1210_v19 = vrot.slane %v3507_v62, 7 }
 0x453   :  { %2873 = vpow2.f32 %v2216_v6 }
 0x454   :  { %2875 = vpow2.f32 %v2217_v8 }
 0x455   :  { %2877 = vpow2.f32 %v2218_v14 }
 0x456   :  { %2879 = vtanh.f32 %v1164_v11 }
 0x457   :  { %2881 = vtanh.f32 %v1168_v38 }
 0x458   :  { %2883 = vpow2.f32 %v2219_v42  ;;  %v1211_v42 = vrot.slane %v3509_v46, 7 }
 0x459   :  { %2885 = vpow2.f32 %v2220_v4 }
 0x45c   :  { %v2872_v55 = vpop.eup %2871 }
 0x45d   :  { %v2874_v10 = vpop.eup %2873  ;;  %v1176_v52 = vadd.f32 1.0, %v2872_v55 }
 0x45e   :  { %v2876_v59 = vpop.eup %2875  ;;  %v1177_v63 = vadd.f32 1.0, %v2874_v10 }
 0x45f   :  { %v2878_v43 = vpop.eup %2877  ;;  %2887 = vrcp.f32 %v1176_v52  ;;  %v1188_v57 = vadd.f32 1.0, %v2876_v59 }
 0x460   :  { %2889 = vrcp.f32 %v1177_v63  ;;  %v1189_v9 = vadd.f32 1.0, %v2878_v43  ;;  %v2880_v6 = vpop.eup %2879 }
 0x461   :  { %2891 = vrcp.f32 %v1188_v57  ;;  %v2882_v8 = vpop.eup %2881 }
 0x462   :  { %2893 = vrcp.f32 %v1189_v9  ;;  %v2884_v14 = vpop.eup %2883 }
 0x463   :  { %v2886_v45 = vpop.eup %2885  ;;  %v1202_v5 = vadd.f32 1.0, %v2884_v14 }
 0x464   :  { %v1203_v4 = vadd.f32 1.0, %v2886_v45 }
 0x465   :  { %2895 = vrcp.f32 %v1202_v5 }
 0x466   :  { %2897 = vrcp.f32 %v1203_v4 }
 0x469   :  { %v2888_v24 = vpop.eup %2887 }
 0x46a   :  { %v2890_v18 = vpop.eup %2889  ;;  %v1216_v36 = vmul.f32 %v2888_v24, %v2880_v6 }
 0x46b   :  { %v2892_v11 = vpop.eup %2891  ;;  %v1217_v38 = vmul.f32 %v2890_v18, %v2882_v8 }
 0x46c   :  { %v2894_v55 = vpop.eup %2893  ;;  %v1214_v10 = vmul.f32 %v2892_v11, %v1210_v19 }
 0x46d   :  { %v1215_v52 = vmul.f32 %v2894_v55, %v1211_v42 }
 0x46e   :  { %v3558_v59 = vadd.f32 %v1216_v36, %v1214_v10 }
 0x46f   :  { %v3560_v63 = vadd.f32 %v1217_v38, %v1215_v52  ;;  %v2896_v62 = vpop.eup %2895 }
 0x470   :  { %2899 = vtanh.f32 %v3558_v59  ;;  %v2898_v43 = vpop.eup %2897 }
 0x471   :  { %2901 = vtanh.f32 %v3560_v63 }
 0x47a   :  { %v2900_v57 = vpop.eup %2899 }
 0x47b   :  { %v2902_v9 = vpop.eup %2901  ;;  %v1222_v6 = vmul.f32 %v2900_v57, %v2896_v62 }
 0x47c   :  { %v1223_v46 = vmul.f32 %v2902_v9, %v2898_v43 }
 0x47d   :  { %1224 = vst [vmem:[#allocation8] sm:$0x8] %v1222_v6  ;;  %v1228_v8 = vrot.slane %v1222_v6, 3 }
 0x47e   :  { %1225 = vst [vmem:[#allocation8 + $0x8] sm:$0x8] %v1223_v46  ;;  %v1229_v14 = vrot.slane %v1223_v46, 2 }
 0x480   :  { %v1230_v45 = vsel %vm538_vm1, %v1229_v14, %v1228_v8 }
 0x481   :  { %1297 = vmatmul.mubr.f32.vlgmr.msra.gmra.mrb[12].mxu0 %v1230_v45  ;;  %1368 = vmatmul.mubr.f32.vlgmr.msra.gmra.mrb[12].mxu1 %v1230_v45 }
 0x482   :  { %2576 = vmatpush1.bf16.msra.mxu0 %v3240_v22  ;;  %2608 = vmatpush1.bf16.msra.mxu1 %v3243_v26 }
 0x483   :  { %2578 = vmatprep.subr.bf16.mxu0 %v3247_v30  ;;  %2610 = vmatprep.subr.bf16.mxu1 %v3249_v31 }
 0x484   :  { %1528 = vmatprep.mubr.f32.mxu0 %v3156_v0  ;;  %1599 = vmatprep.mubr.f32.mxu1 %v3156_v0 }
 0x486   :  { %2580 = vmatpush1.bf16.msra.mxu0 %v3253_v35  ;;  %2612 = vmatpush1.bf16.msra.mxu1 %v3257_v39 }
 0x487   :  { %2582 = vmatprep.subr.bf16.mxu0 %v3259_v40  ;;  %2614 = vmatprep.subr.bf16.mxu1 %v3262_v44 }
 0x48a   :  { %2584 = vmatpush1.bf16.msra.mxu0 %v3267_v51  ;;  %2616 = vmatpush1.bf16.msra.mxu1 %v3271_v53 }
 0x48b   :  { %2586 = vmatprep.subr.bf16.mxu0 %v3273_v54  ;;  %2618 = vmatprep.subr.bf16.mxu1 %v3276_v58 }
 0x48e   :  { %2588 = vmatpush1.bf16.msra.mxu0 %v3279_v1  ;;  %2620 = vmatpush1.bf16.msra.mxu1 %v3283_v2 }
 0x48f   :  { %2590 = vmatprep.subr.bf16.mxu0 %v3285_v3  ;;  %2622 = vmatprep.subr.bf16.mxu1 %v3288_v7 }
 0x492   :  { %2592 = vmatpush1.bf16.msra.mxu0 %v3291_v13  ;;  %2624 = vmatpush1.bf16.msra.mxu1 %v3295_v15 }
 0x493   :  { %2594 = vmatprep.subr.bf16.mxu0 %v3297_v16  ;;  %2626 = vmatprep.subr.bf16.mxu1 %v3300_v23 }
 0x496   :  { %2596 = vmatpush1.bf16.msra.mxu0 %v3306_v32  ;;  %2628 = vmatpush1.bf16.msra.mxu1 %v3311_v33 }
 0x497   :  { %2598 = vmatprep.subr.bf16.mxu0 %v3313_v34  ;;  %2630 = vmatprep.subr.bf16.mxu1 %v3316_v41 }
 0x49a   :  { %2600 = vmatpush1.bf16.msra.mxu0 %v3319_v48  ;;  %2632 = vmatpush1.bf16.msra.mxu1 %v3323_v49 }
 0x49b   :  { %2602 = vmatprep.subr.bf16.mxu0 %v3325_v50  ;;  %2634 = vmatprep.subr.bf16.mxu1 %v3328_v56 }
 0x49e   :  { %2604 = vmatpush1.bf16.msra.mxu0 %v3331_v60  ;;  %2636 = vmatpush1.bf16.msra.mxu1 %v3335_v61 }
 0x49f   :  { %2638 = vmatprep.subr.bf16.mxu0 %v3236_v17  ;;  %2670 = vmatprep.subr.bf16.mxu1 %v3238_v21 }
 0x554   :  { %v1298_v24 = vpop.f32.mrb[12].mxu0  ;;  %v1369_v18 = vpop.f32.mrb[12].mxu1 }
 0x555   :  { %v1378_v36 = vrot.slane %v1298_v24, 4  ;;  %v1382_v19 = vrot.slane %v1298_v24, 5  ;;  %v1300_v5 = vpop.f32.mrb[13].mxu0  ;;  %v1371_v11 = vpop.f32.mrb[13].mxu1  ;;  %v1380_v8 = vrot.slane %v1369_v18, 4  ;;  %v1384_v14 = vrot.slane %v1369_v18, 5 }
 0x556   :  { %v1379_v38 = vrot.slane %v1300_v5, 4  ;;  %v1383_v42 = vrot.slane %v1300_v5, 5  ;;  %v1381_v6 = vrot.slane %v1371_v11, 4  ;;  %v1385_v46 = vrot.slane %v1371_v11, 5 }
 0x557   :  { %v1394_v4 = vadd.f32 %v1378_v36, %v3381_v27  ;;  %v1398_v55 = vadd.f32 %v1382_v19, %v3385_v37  ;;  %v1396_v36 = vadd.f32 %v1380_v8, %v3398_v25  ;;  %v1400_v19 = vadd.f32 %v1384_v14, %v3401_v29 }
 0x558   :  { %v1395_v10 = vadd.f32 %v1379_v38, %v3383_v28  ;;  %v1399_v52 = vadd.f32 %v1383_v42, %v3388_v47  ;;  %v1397_v45 = vadd.f32 %v1381_v6, %v3395_v20  ;;  %v1401_v24 = vadd.f32 %v1385_v46, %v3393_v12 }
 0x559   :  { %v2221_v62 = vmul.f32 -1.442695, %v1394_v4  ;;  %v2222_v43 = vmul.f32 -1.442695, %v1398_v55 }
 0x55a   :  { %v2223_v57 = vmul.f32 -1.442695, %v1395_v10  ;;  %v2224_v9 = vmul.f32 -1.442695, %v1399_v52  ;;  %v2225_v5 = vmul.f32 -1.442695, %v1397_v45 }
 0x55b   :  { %2903 = vpow2.f32 %v2221_v62  ;;  %v2226_v38 = vmul.f32 -1.442695, %v1401_v24  ;;  %v1442_v45 = vrot.slane %v3558_v59, 7 }
 0x55c   :  { %2905 = vpow2.f32 %v2222_v43 }
 0x55d   :  { %2907 = vpow2.f32 %v2223_v57 }
 0x55e   :  { %2909 = vpow2.f32 %v2224_v9 }
 0x55f   :  { %2911 = vtanh.f32 %v1396_v36 }
 0x560   :  { %2913 = vtanh.f32 %v1400_v19 }
 0x561   :  { %2915 = vpow2.f32 %v2225_v5  ;;  %v1443_v5 = vrot.slane %v3560_v63, 7 }
 0x562   :  { %2917 = vpow2.f32 %v2226_v38 }
 0x565   :  { %v2904_v42 = vpop.eup %2903 }
 0x566   :  { %v2906_v4 = vpop.eup %2905  ;;  %v1408_v11 = vadd.f32 1.0, %v2904_v42 }
 0x567   :  { %v2908_v55 = vpop.eup %2907  ;;  %v1409_v18 = vadd.f32 1.0, %v2906_v4 }
 0x568   :  { %v2910_v10 = vpop.eup %2909  ;;  %2919 = vrcp.f32 %v1408_v11  ;;  %v1420_v52 = vadd.f32 1.0, %v2908_v55 }
 0x569   :  { %2921 = vrcp.f32 %v1409_v18  ;;  %v1421_v62 = vadd.f32 1.0, %v2910_v10  ;;  %v2912_v43 = vpop.eup %2911 }
 0x56a   :  { %2923 = vrcp.f32 %v1420_v52  ;;  %v2914_v57 = vpop.eup %2913 }
 0x56b   :  { %2925 = vrcp.f32 %v1421_v62  ;;  %v2916_v9 = vpop.eup %2915 }
 0x56c   :  { %v2918_v6 = vpop.eup %2917  ;;  %v1434_v24 = vadd.f32 1.0, %v2916_v9 }
 0x56d   :  { %v1435_v38 = vadd.f32 1.0, %v2918_v6 }
 0x56e   :  { %2927 = vrcp.f32 %v1434_v24 }
 0x56f   :  { %2929 = vrcp.f32 %v1435_v38 }
 0x572   :  { %v2920_v46 = vpop.eup %2919 }
 0x573   :  { %v2922_v8 = vpop.eup %2921  ;;  %v1448_v14 = vmul.f32 %v2920_v46, %v2912_v43 }
 0x574   :  { %v2924_v36 = vpop.eup %2923  ;;  %v1449_v19 = vmul.f32 %v2922_v8, %v2914_v57 }
 0x575   :  { %v2926_v42 = vpop.eup %2925  ;;  %v1446_v4 = vmul.f32 %v2924_v36, %v1442_v45 }
 0x576   :  { %v1447_v11 = vmul.f32 %v2926_v42, %v1443_v5 }
 0x577   :  { %v3609_v55 = vadd.f32 %v1448_v14, %v1446_v4 }
 0x578   :  { %v3611_v18 = vadd.f32 %v1449_v19, %v1447_v11  ;;  %v2928_v59 = vpop.eup %2927 }
 0x579   :  { %2931 = vtanh.f32 %v3609_v55  ;;  %v2930_v10 = vpop.eup %2929 }
 0x57a   :  { %2933 = vtanh.f32 %v3611_v18 }
 0x583   :  { %v2932_v52 = vpop.eup %2931 }
 0x584   :  { %v2934_v62 = vpop.eup %2933  ;;  %v1454_v43 = vmul.f32 %v2932_v52, %v2928_v59 }
 0x585   :  { %v1455_v63 = vmul.f32 %v2934_v62, %v2930_v10 }
 0x586   :  { %1456 = vst [vmem:[#allocation8] sm:$0x10] %v1454_v43  ;;  %v1460_v57 = vrot.slane %v1454_v43, 4 }
 0x587   :  { %1457 = vst [vmem:[#allocation8 + $0x8] sm:$0x10] %v1455_v63  ;;  %v1461_v9 = vrot.slane %v1455_v63, 3 }
 0x589   :  { %v1462_v6 = vsel %vm538_vm1, %v1461_v9, %v1460_v57 }
 0x58a   :  { %1529 = vmatmul.mubr.f32.vlgmr.msra.gmra.mrb[14].mxu0 %v1462_v6  ;;  %1600 = vmatmul.mubr.f32.vlgmr.msra.gmra.mrb[14].mxu1 %v1462_v6 }
 0x58b   :  { %2640 = vmatpush1.bf16.msra.mxu0 %v3240_v22  ;;  %2672 = vmatpush1.bf16.msra.mxu1 %v3243_v26 }
 0x58c   :  { %2642 = vmatprep.subr.bf16.mxu0 %v3247_v30  ;;  %2674 = vmatprep.subr.bf16.mxu1 %v3249_v31 }
 0x58d   :  { %1760 = vmatprep.mubr.f32.mxu0 %v3156_v0  ;;  %1831 = vmatprep.mubr.f32.mxu1 %v3156_v0 }
 0x58f   :  { %2644 = vmatpush1.bf16.msra.mxu0 %v3253_v35  ;;  %2676 = vmatpush1.bf16.msra.mxu1 %v3257_v39 }
 0x590   :  { %2646 = vmatprep.subr.bf16.mxu0 %v3259_v40  ;;  %2678 = vmatprep.subr.bf16.mxu1 %v3262_v44 }
 0x593   :  { %2648 = vmatpush1.bf16.msra.mxu0 %v3267_v51  ;;  %2680 = vmatpush1.bf16.msra.mxu1 %v3271_v53 }
 0x594   :  { %2650 = vmatprep.subr.bf16.mxu0 %v3273_v54  ;;  %2682 = vmatprep.subr.bf16.mxu1 %v3276_v58 }
 0x597   :  { %2652 = vmatpush1.bf16.msra.mxu0 %v3279_v1  ;;  %2684 = vmatpush1.bf16.msra.mxu1 %v3283_v2 }
 0x598   :  { %2654 = vmatprep.subr.bf16.mxu0 %v3285_v3  ;;  %2686 = vmatprep.subr.bf16.mxu1 %v3288_v7 }
 0x59b   :  { %2656 = vmatpush1.bf16.msra.mxu0 %v3291_v13  ;;  %2688 = vmatpush1.bf16.msra.mxu1 %v3295_v15 }
 0x59c   :  { %2658 = vmatprep.subr.bf16.mxu0 %v3297_v16  ;;  %2690 = vmatprep.subr.bf16.mxu1 %v3300_v23 }
 0x59f   :  { %2660 = vmatpush1.bf16.msra.mxu0 %v3306_v32  ;;  %2692 = vmatpush1.bf16.msra.mxu1 %v3311_v33 }
 0x5a0   :  { %2662 = vmatprep.subr.bf16.mxu0 %v3313_v34  ;;  %2694 = vmatprep.subr.bf16.mxu1 %v3316_v41 }
 0x5a3   :  { %2664 = vmatpush1.bf16.msra.mxu0 %v3319_v48  ;;  %2696 = vmatpush1.bf16.msra.mxu1 %v3323_v49 }
 0x5a4   :  { %2666 = vmatprep.subr.bf16.mxu0 %v3325_v50  ;;  %2698 = vmatprep.subr.bf16.mxu1 %v3328_v56 }
 0x5a7   :  { %2668 = vmatpush1.bf16.msra.mxu0 %v3331_v60  ;;  %2700 = vmatpush1.bf16.msra.mxu1 %v3335_v61 }
 0x5a8   :  { %2702 = vmatprep.subr.bf16.mxu0 %v3236_v17  ;;  %2734 = vmatprep.subr.bf16.mxu1 %v3238_v21 }
 0x65d   :  { %v1530_v46 = vpop.f32.mrb[14].mxu0  ;;  %v1601_v8 = vpop.f32.mrb[14].mxu1 }
 0x65e   :  { %v1610_v14 = vrot.slane %v1530_v46, 3  ;;  %v1614_v45 = vrot.slane %v1530_v46, 4  ;;  %v1532_v24 = vpop.f32.mrb[15].mxu0  ;;  %v1603_v36 = vpop.f32.mrb[15].mxu1  ;;  %v1612_v43 = vrot.slane %v1601_v8, 3  ;;  %v1616_v63 = vrot.slane %v1601_v8, 4 }
 0x65f   :  { %v1611_v19 = vrot.slane %v1532_v24, 3  ;;  %v1615_v5 = vrot.slane %v1532_v24, 4  ;;  %v1613_v52 = vrot.slane %v1603_v36, 3  ;;  %v1617_v62 = vrot.slane %v1603_v36, 4 }
 0x660   :  { %v1626_v38 = vadd.f32 %v1610_v14, %v3381_v27  ;;  %v1630_v42 = vadd.f32 %v1614_v45, %v3385_v37  ;;  %v1628_v6 = vadd.f32 %v1612_v43, %v3398_v25  ;;  %v1632_v46 = vadd.f32 %v1616_v63, %v3401_v29 }
 0x661   :  { %v1627_v4 = vadd.f32 %v1611_v19, %v3383_v28  ;;  %v1631_v11 = vadd.f32 %v1615_v5, %v3388_v47  ;;  %v1629_v57 = vadd.f32 %v1613_v52, %v3395_v20  ;;  %v1633_v9 = vadd.f32 %v1617_v62, %v3393_v12 }
 0x662   :  { %v2227_v59 = vmul.f32 -1.442695, %v1626_v38  ;;  %v2228_v17 = vmul.f32 -1.442695, %v1630_v42  ;;  %v1674_v43 = vrot.slane %v3609_v55, 7 }
 0x663   :  { %v2229_v10 = vmul.f32 -1.442695, %v1627_v4  ;;  %v2230_v21 = vmul.f32 -1.442695, %v1631_v11  ;;  %v2231_v14 = vmul.f32 -1.442695, %v1629_v57 }
 0x664   :  { %2935 = vpow2.f32 %v2227_v59  ;;  %v2232_v45 = vmul.f32 -1.442695, %v1633_v9 }
 0x665   :  { %2937 = vpow2.f32 %v2228_v17 }
 0x666   :  { %2939 = vpow2.f32 %v2229_v10 }
 0x667   :  { %2941 = vpow2.f32 %v2230_v21 }
 0x668   :  { %2943 = vtanh.f32 %v1628_v6  ;;  %v1675_v6 = vrot.slane %v3611_v18, 7 }
 0x669   :  { %2945 = vtanh.f32 %v1632_v46 }
 0x66a   :  { %2947 = vpow2.f32 %v2231_v14 }
 0x66b   :  { %2949 = vpow2.f32 %v2232_v45 }
 0x66e   :  { %v2936_v24 = vpop.eup %2935 }
 0x66f   :  { %v2938_v19 = vpop.eup %2937  ;;  %v1640_v36 = vadd.f32 1.0, %v2936_v24 }
 0x670   :  { %v2940_v5 = vpop.eup %2939  ;;  %v1641_v8 = vadd.f32 1.0, %v2938_v19 }
 0x671   :  { %v2942_v38 = vpop.eup %2941  ;;  %2951 = vrcp.f32 %v1640_v36  ;;  %v1652_v42 = vadd.f32 1.0, %v2940_v5 }
 0x672   :  { %2953 = vrcp.f32 %v1641_v8  ;;  %v1653_v4 = vadd.f32 1.0, %v2942_v38  ;;  %v2944_v11 = vpop.eup %2943 }
 0x673   :  { %2955 = vrcp.f32 %v1652_v42  ;;  %v2946_v59 = vpop.eup %2945 }
 0x674   :  { %2957 = vrcp.f32 %v1653_v4  ;;  %v2948_v17 = vpop.eup %2947 }
 0x675   :  { %v2950_v10 = vpop.eup %2949  ;;  %v1666_v63 = vadd.f32 1.0, %v2948_v17 }
 0x676   :  { %v1667_v46 = vadd.f32 1.0, %v2950_v10 }
 0x677   :  { %2959 = vrcp.f32 %v1666_v63 }
 0x678   :  { %2961 = vrcp.f32 %v1667_v46 }
 0x67b   :  { %v2952_v21 = vpop.eup %2951 }
 0x67c   :  { %v2954_v52 = vpop.eup %2953  ;;  %v1680_v62 = vmul.f32 %v2952_v21, %v2944_v11 }
 0x67d   :  { %v2956_v57 = vpop.eup %2955  ;;  %v1681_v9 = vmul.f32 %v2954_v52, %v2946_v59 }
 0x67e   :  { %v2958_v14 = vpop.eup %2957  ;;  %v1678_v45 = vmul.f32 %v2956_v57, %v1674_v43 }
 0x67f   :  { %v1679_v24 = vmul.f32 %v2958_v14, %v1675_v6 }
 0x680   :  { %v3660_v19 = vadd.f32 %v1680_v62, %v1678_v45 }
 0x681   :  { %v3662_v36 = vadd.f32 %v1681_v9, %v1679_v24  ;;  %v2960_v55 = vpop.eup %2959 }
 0x682   :  { %2963 = vtanh.f32 %v3660_v19  ;;  %v2962_v5 = vpop.eup %2961  ;;  %v1906_v46 = vrot.slane %v3660_v19, 7 }
 0x683   :  { %2965 = vtanh.f32 %v3662_v36 }
 0x68c   :  { %v2964_v8 = vpop.eup %2963 }
 0x68d   :  { %v2966_v38 = vpop.eup %2965  ;;  %v1686_v42 = vmul.f32 %v2964_v8, %v2960_v55  ;;  %v1907_v55 = vrot.slane %v3662_v36, 7 }
 0x68e   :  { %v1687_v18 = vmul.f32 %v2966_v38, %v2962_v5 }
 0x68f   :  { %1688 = vst [vmem:[#allocation8] sm:$0x20] %v1686_v42  ;;  %v1692_v4 = vrot.slane %v1686_v42, 5 }
 0x690   :  { %1689 = vst [vmem:[#allocation8 + $0x8] sm:$0x20] %v1687_v18  ;;  %v1693_v11 = vrot.slane %v1687_v18, 4 }
 0x692   :  { %v1694_v59 = vsel %vm538_vm1, %v1693_v11, %v1692_v4 }
 0x693   :  { %1761 = vmatmul.mubr.f32.vlgmr.msra.gmra.mrb[16].mxu0 %v1694_v59  ;;  %1832 = vmatmul.mubr.f32.vlgmr.msra.gmra.mrb[16].mxu1 %v1694_v59 }
 0x694   :  { %2704 = vmatpush1.bf16.msra.mxu0 %v3240_v22  ;;  %2736 = vmatpush1.bf16.msra.mxu1 %v3243_v26 }
 0x695   :  { %2706 = vmatprep.subr.bf16.mxu0 %v3247_v30  ;;  %2738 = vmatprep.subr.bf16.mxu1 %v3249_v31 }
 0x696   :  { %1992 = vmatprep.mubr.f32.mxu0 %v3156_v0  ;;  %2063 = vmatprep.mubr.f32.mxu1 %v3156_v0 }
 0x698   :  { %2708 = vmatpush1.bf16.msra.mxu0 %v3253_v35  ;;  %2740 = vmatpush1.bf16.msra.mxu1 %v3257_v39 }
 0x699   :  { %2710 = vmatprep.subr.bf16.mxu0 %v3259_v40  ;;  %2742 = vmatprep.subr.bf16.mxu1 %v3262_v44 }
 0x69c   :  { %2712 = vmatpush1.bf16.msra.mxu0 %v3267_v51  ;;  %2744 = vmatpush1.bf16.msra.mxu1 %v3271_v53 }
 0x69d   :  { %2714 = vmatprep.subr.bf16.mxu0 %v3273_v54  ;;  %2746 = vmatprep.subr.bf16.mxu1 %v3276_v58 }
 0x6a0   :  { %2716 = vmatpush1.bf16.msra.mxu0 %v3279_v1  ;;  %2748 = vmatpush1.bf16.msra.mxu1 %v3283_v2 }
 0x6a1   :  { %2718 = vmatprep.subr.bf16.mxu0 %v3285_v3  ;;  %2750 = vmatprep.subr.bf16.mxu1 %v3288_v7 }
 0x6a4   :  { %2720 = vmatpush1.bf16.msra.mxu0 %v3291_v13  ;;  %2752 = vmatpush1.bf16.msra.mxu1 %v3295_v15 }
 0x6a5   :  { %2722 = vmatprep.subr.bf16.mxu0 %v3297_v16  ;;  %2754 = vmatprep.subr.bf16.mxu1 %v3300_v23 }
 0x6a8   :  { %2724 = vmatpush1.bf16.msra.mxu0 %v3306_v32  ;;  %2756 = vmatpush1.bf16.msra.mxu1 %v3311_v33 }
 0x6a9   :  { %2726 = vmatprep.subr.bf16.mxu0 %v3313_v34  ;;  %2758 = vmatprep.subr.bf16.mxu1 %v3316_v41 }
 0x6ac   :  { %2728 = vmatpush1.bf16.msra.mxu0 %v3319_v48  ;;  %2760 = vmatpush1.bf16.msra.mxu1 %v3323_v49 }
 0x6ad   :  { %2730 = vmatprep.subr.bf16.mxu0 %v3325_v50  ;;  %2762 = vmatprep.subr.bf16.mxu1 %v3328_v56 }
 0x6b0   :  { %2732 = vmatpush1.bf16.msra.mxu0 %v3331_v60  ;;  %2764 = vmatpush1.bf16.msra.mxu1 %v3335_v61 }
 0x766   :  { %v1762_v0 = vpop.f32.mrb[16].mxu0  ;;  %v1833_v22 = vpop.f32.mrb[16].mxu1 }
 0x767   :  { %v1842_v26 = vrot.slane %v1762_v0, 2  ;;  %v1846_v30 = vrot.slane %v1762_v0, 3  ;;  %v1764_v31 = vpop.f32.mrb[17].mxu0  ;;  %v1835_v35 = vpop.f32.mrb[17].mxu1  ;;  %v1844_v15 = vrot.slane %v1833_v22, 2  ;;  %v1848_v16 = vrot.slane %v1833_v22, 3 }
 0x768   :  { %v1843_v39 = vrot.slane %v1764_v31, 2  ;;  %v1847_v40 = vrot.slane %v1764_v31, 3  ;;  %v1845_v7 = vrot.slane %v1835_v35, 2  ;;  %v1849_v13 = vrot.slane %v1835_v35, 3 }
 0x769   :  { %v1858_v44 = vadd.f32 %v1842_v26, %v3381_v27  ;;  %v1862_v51 = vadd.f32 %v1846_v30, %v3385_v37  ;;  %v1860_v33 = vadd.f32 %v1844_v15, %v3398_v25  ;;  %v1864_v34 = vadd.f32 %v1848_v16, %v3401_v29 }
 0x76a   :  { %v1859_v53 = vadd.f32 %v1843_v39, %v3383_v28  ;;  %v1863_v54 = vadd.f32 %v1847_v40, %v3388_v47  ;;  %v1861_v23 = vadd.f32 %v1845_v7, %v3395_v20  ;;  %v1865_v32 = vadd.f32 %v1849_v13, %v3393_v12 }
 0x76b   :  { %v2233_v58 = vmul.f32 -1.442695, %v1858_v44  ;;  %v2234_v1 = vmul.f32 -1.442695, %v1862_v51 }
 0x76c   :  { %v2235_v2 = vmul.f32 -1.442695, %v1859_v53  ;;  %v2236_v3 = vmul.f32 -1.442695, %v1863_v54  ;;  %v2237_v41 = vmul.f32 -1.442695, %v1861_v23 }
 0x76d   :  { %2967 = vpow2.f32 %v2233_v58  ;;  %v2238_v48 = vmul.f32 -1.442695, %v1865_v32 }
 0x76e   :  { %2969 = vpow2.f32 %v2234_v1 }
 0x76f   :  { %2971 = vpow2.f32 %v2235_v2 }
 0x770   :  { %2973 = vpow2.f32 %v2236_v3 }
 0x771   :  { %2975 = vtanh.f32 %v1860_v33 }
 0x772   :  { %2977 = vtanh.f32 %v1864_v34 }
 0x773   :  { %2979 = vpow2.f32 %v2237_v41 }
 0x774   :  { %2981 = vpow2.f32 %v2238_v48 }
 0x777   :  { %v2968_v49 = vpop.eup %2967 }
 0x778   :  { %v2970_v50 = vpop.eup %2969  ;;  %v1872_v56 = vadd.f32 1.0, %v2968_v49 }
 0x779   :  { %v2972_v60 = vpop.eup %2971  ;;  %v1873_v61 = vadd.f32 1.0, %v2970_v50 }
 0x77a   :  { %v2974_v17 = vpop.eup %2973  ;;  %2983 = vrcp.f32 %v1872_v56  ;;  %v1884_v10 = vadd.f32 1.0, %v2972_v60 }
 0x77b   :  { %2985 = vrcp.f32 %v1873_v61  ;;  %v1885_v21 = vadd.f32 1.0, %v2974_v17  ;;  %v2976_v52 = vpop.eup %2975 }
 0x77c   :  { %2987 = vrcp.f32 %v1884_v10  ;;  %v2978_v62 = vpop.eup %2977 }
 0x77d   :  { %2989 = vrcp.f32 %v1885_v21  ;;  %v2980_v43 = vpop.eup %2979 }
 0x77e   :  { %v2982_v63 = vpop.eup %2981  ;;  %v1898_v14 = vadd.f32 1.0, %v2980_v43 }
 0x77f   :  { %v1899_v5 = vadd.f32 1.0, %v2982_v63 }
 0x780   :  { %2991 = vrcp.f32 %v1898_v14 }
 0x781   :  { %2993 = vrcp.f32 %v1899_v5 }
 0x784   :  { %v2984_v57 = vpop.eup %2983 }
 0x785   :  { %v2986_v9 = vpop.eup %2985  ;;  %v1912_v6 = vmul.f32 %v2984_v57, %v2976_v52 }
 0x786   :  { %v2988_v45 = vpop.eup %2987  ;;  %v1913_v24 = vmul.f32 %v2986_v9, %v2978_v62 }
 0x787   :  { %v2990_v8 = vpop.eup %2989  ;;  %v1910_v38 = vmul.f32 %v2988_v45, %v1906_v46 }
 0x788   :  { %v1911_v42 = vmul.f32 %v2990_v8, %v1907_v55 }
 0x789   :  { %v3709_v18 = vadd.f32 %v1912_v6, %v1910_v38 }
 0x78a   :  { %v3711_v4 = vadd.f32 %v1913_v24, %v1911_v42  ;;  %v2992_v19 = vpop.eup %2991 }
 0x78b   :  { %2995 = vtanh.f32 %v3709_v18  ;;  %v2994_v11 = vpop.eup %2993  ;;  %v2138_v57 = vrot.slane %v3709_v18, 7 }
 0x78c   :  { %2997 = vtanh.f32 %v3711_v4  ;;  %v2139_v14 = vrot.slane %v3711_v4, 7 }
 0x795   :  { %v2996_v59 = vpop.eup %2995 }
 0x796   :  { %v2998_v0 = vpop.eup %2997  ;;  %v1918_v22 = vmul.f32 %v2996_v59, %v2992_v19 }
 0x797   :  { %v1919_v36 = vmul.f32 %v2998_v0, %v2994_v11 }
 0x798   :  { %1920 = vst [vmem:[#allocation8] sm:$0x40] %v1918_v22  ;;  %v1924_v26 = vrot.slane %v1918_v22, 6 }
 0x799   :  { %1921 = vst [vmem:[#allocation8 + $0x8] sm:$0x40] %v1919_v36  ;;  %v1925_v30 = vrot.slane %v1919_v36, 5 }
 0x79b   :  { %v1926_v31 = vsel %vm538_vm1, %v1925_v30, %v1924_v26 }
 0x79c   :  { %1993 = vmatmul.mubr.f32.vlgmr.msra.gmra.mrb[18].mxu0 %v1926_v31  ;;  %2064 = vmatmul.mubr.f32.vlgmr.msra.gmra.mrb[18].mxu1 %v1926_v31 }
 0x86f   :  { %v1994_v35 = vpop.f32.mrb[18].mxu0  ;;  %v2065_v39 = vpop.f32.mrb[18].mxu1 }
 0x870   :  { %v2074_v40 = vrot.slane %v1994_v35, 1  ;;  %v2078_v44 = vrot.slane %v1994_v35, 2  ;;  %v1996_v51 = vpop.f32.mrb[19].mxu0  ;;  %v2067_v53 = vpop.f32.mrb[19].mxu1  ;;  %v2076_v34 = vrot.slane %v2065_v39, 1  ;;  %v2080_v41 = vrot.slane %v2065_v39, 2 }
 0x871   :  { %v2075_v54 = vrot.slane %v1996_v51, 1  ;;  %v2079_v58 = vrot.slane %v1996_v51, 2  ;;  %v2077_v32 = vrot.slane %v2067_v53, 1  ;;  %v2081_v33 = vrot.slane %v2067_v53, 2 }
 0x872   :  { %v2090_v1 = vadd.f32 %v2074_v40, %v3381_v27  ;;  %v2094_v2 = vadd.f32 %v2078_v44, %v3385_v37 }
 0x873   :  { %v2091_v3 = vadd.f32 %v2075_v54, %v3383_v28  ;;  %v2095_v7 = vadd.f32 %v2079_v58, %v3388_v47  ;;  %v2093_v27 = vadd.f32 %v2077_v32, %v3395_v20  ;;  %v2097_v37 = vadd.f32 %v2081_v33, %v3393_v12 }
 0x874   :  { %v2239_v13 = vmul.f32 -1.442695, %v2090_v1  ;;  %v2240_v15 = vmul.f32 -1.442695, %v2094_v2  ;;  %v2092_v28 = vadd.f32 %v2076_v34, %v3398_v25  ;;  %v2096_v47 = vadd.f32 %v2080_v41, %v3401_v29 }
 0x875   :  { %v2241_v16 = vmul.f32 -1.442695, %v2091_v3  ;;  %v2242_v23 = vmul.f32 -1.442695, %v2095_v7  ;;  %v2243_v48 = vmul.f32 -1.442695, %v2093_v27 }
 0x876   :  { %2999 = vpow2.f32 %v2239_v13  ;;  %v2244_v49 = vmul.f32 -1.442695, %v2097_v37 }
 0x877   :  { %3001 = vpow2.f32 %v2240_v15 }
 0x878   :  { %3003 = vpow2.f32 %v2241_v16 }
 0x879   :  { %3005 = vpow2.f32 %v2242_v23 }
 0x87a   :  { %3007 = vtanh.f32 %v2092_v28 }
 0x87b   :  { %3009 = vtanh.f32 %v2096_v47 }
 0x87c   :  { %3011 = vpow2.f32 %v2243_v48 }
 0x87d   :  { %3013 = vpow2.f32 %v2244_v49 }
 0x880   :  { %v3000_v50 = vpop.eup %2999 }
 0x881   :  { %v3002_v56 = vpop.eup %3001  ;;  %v2104_v60 = vadd.f32 1.0, %v3000_v50 }
 0x882   :  { %v3004_v61 = vpop.eup %3003  ;;  %v2105_v17 = vadd.f32 1.0, %v3002_v56 }
 0x883   :  { %v3006_v10 = vpop.eup %3005  ;;  %3015 = vrcp.f32 %v2104_v60  ;;  %v2116_v20 = vadd.f32 1.0, %v3004_v61 }
 0x884   :  { %3017 = vrcp.f32 %v2105_v17  ;;  %v2117_v12 = vadd.f32 1.0, %v3006_v10  ;;  %v3008_v25 = vpop.eup %3007 }
 0x885   :  { %3019 = vrcp.f32 %v2116_v20  ;;  %v3010_v29 = vpop.eup %3009 }
 0x886   :  { %3021 = vrcp.f32 %v2117_v12  ;;  %v3012_v21 = vpop.eup %3011 }
 0x887   :  { %v3014_v52 = vpop.eup %3013  ;;  %v2130_v9 = vadd.f32 1.0, %v3012_v21 }
 0x888   :  { %v2131_v45 = vadd.f32 1.0, %v3014_v52 }
 0x889   :  { %3023 = vrcp.f32 %v2130_v9 }
 0x88a   :  { %3025 = vrcp.f32 %v2131_v45 }
 0x88d   :  { %v3016_v62 = vpop.eup %3015 }
 0x88e   :  { %v3018_v43 = vpop.eup %3017  ;;  %v2144_v63 = vmul.f32 %v3016_v62, %v3008_v25 }
 0x88f   :  { %v3020_v6 = vpop.eup %3019  ;;  %v2145_v46 = vmul.f32 %v3018_v43, %v3010_v29 }
 0x890   :  { %v3022_v24 = vpop.eup %3021  ;;  %v2142_v55 = vmul.f32 %v3020_v6, %v2138_v57 }
 0x891   :  { %v2143_v5 = vmul.f32 %v3022_v24, %v2139_v14 }
 0x892   :  { %v2146_v8 = vadd.f32 %v2144_v63, %v2142_v55 }
 0x893   :  { %v2147_v38 = vadd.f32 %v2145_v46, %v2143_v5  ;;  %v3024_v42 = vpop.eup %3023 }
 0x894   :  { %3027 = vtanh.f32 %v2146_v8  ;;  %v3026_v19 = vpop.eup %3025 }
 0x895   :  { %3029 = vtanh.f32 %v2147_v38 }
 0x89e   :  { %v3028_v18 = vpop.eup %3027 }
 0x89f   :  { %v3030_v11 = vpop.eup %3029  ;;  %v2150_v59 = vmul.f32 %v3028_v18, %v3024_v42 }
 0x8a0   :  { %v2151_v4 = vmul.f32 %v3030_v11, %v3026_v19 }
 0x8a1   :  { %2152 = vst [vmem:[#allocation8] sm:$0x80] %v2150_v59  ;;  %2159 = vst [vmem:[#allocation9 - $0x7] sm:$0x80] %v2150_v59 }
 0x8a2   :  { %2153 = vst [vmem:[#allocation8 + $0x8] sm:$0x80] %v2151_v4  ;;  %v2156_v0 = vrot.slane %v2151_v4, 7 }
 0x8a3   :  { %3108 = shalt.err (!%p3105_p0)
}
 0x8a4   :  { %s3109_s13 = scalar_lea.hbm %s3757_s4, 256 }
 0x8a5   :  { %p3110_p1 = scmp.ne.s32.totalorder %s3757_s4, %s3109_s13  ;;  %p3113_p2 = scmp.lt.u32.totalorder %s3109_s13, %s3757_s4 }
 0x8a7   :  { %p3115_p3 = pnand %p3113_p2, %p3110_p1 }
 0x8a9   :  { %3118 = shalt.err (!%p3115_p3)
}
 0x8aa   :  { %2172 = dma.vmem_to_hbm [thread:$0]  %s2167_s29, 256, %s3757_s4, [#allocation4], %s3153_s1, %s3153_s1, %s3154_s17   ;;  %2160 = vst [vmem:[#allocation9 + $0x1] sm:$0x1] %v2156_v0 }
 0x8ab   :  { %s3119_s21 = scalar_lea.vmem %s2180_s9, 32  ;;  %p3124_p5 = scmp.lt.s32.totalorder %s2180_s9, %s2180_s9 }
 0x8ac   :  { %p3120_p4 = scmp.ne.s32.totalorder %s2180_s9, %s3119_s21  ;;  %p3125_p6 = scmp.lt.s32.totalorder %s3119_s21, %s3119_s21 }
 0x8ae   :  { %p3126_p7 = por %p3125_p6, %p3124_p5 }
 0x8b0   :  { %p3127_p8 = pnand %p3126_p7, %p3120_p4 }
 0x8b2   :  { %3130 = shalt.err (!%p3127_p8)
}
 0x8b3   :  { %s3131_s24 = scalar_lea.hbm %s3758_s5, 32 }
 0x8b4   :  { %p3132_p9 = scmp.ne.s32.totalorder %s3758_s5, %s3131_s24  ;;  %p3135_p10 = scmp.lt.u32.totalorder %s3131_s24, %s3758_s5 }
 0x8b6   :  { %p3137_p11 = pnand %p3135_p10, %p3132_p9 }
 0x8b8   :  { %3140 = shalt.err (!%p3137_p11)
}
 0x8b9   :  { %2182 = dma.vmem_to_hbm [thread:$0]  %s2180_s9, 32, %s3758_s5, [#allocation10]  }
 0x8ba   :  { %3145 = dma.done.wait [#allocation4], 256  }
 0x8bb   :  { %3146 = vsyncadd [#allocation4], 4294967040 }
 0x8bc   :  { %3147 = dma.done.wait [#allocation10], 32  }
 0x8bd   :  { %3148 = vsyncadd [#allocation10], 4294967264 }
 0x8be   :  { %2189 = vsyncpa [#allocation3], 1 }
 0x8bf   :  { %2190 = vsyncpa [#allocation6], 1 }
 0x8c0   :  { %2191 = vsyncpa [#allocation4], 1 }
 0x8c1   :  { %2192 = vsyncpa [#allocation10], 1 }

</bundles_post_ra>
